<compile_context>
chip_gen: v7x
topology: tpu7x:2x2x1
jax: 0.10.0
libtpu: 0.0.40
codegen_flags: <defaults>
</compile_context>

<pallas_src>
import functools
import math

import jax
import jax.numpy as jnp
import numpy as np
from jax.experimental import pallas as pl
from jax.experimental.pallas import tpu as pltpu

PSP_SIZES = (1, 2, 4)  # static pyramid bin sizes (kept OUT of traced params)


def _round_up(x, m):
    return ((x + m - 1) // m) * m


def _pick_tm(M):
    """Row-tile selection bounding M padding waste to <=12.5%."""
    Mp8 = _round_up(max(int(M), 1), 8)
    for cand in (512, 256, 128, 64, 32, 16, 8):
        if cand > Mp8:
            continue
        padded = _round_up(Mp8, cand)
        if (padded - Mp8) <= padded // 8:
            return cand, padded
    return 8, Mp8


# ----------------------------------------------------------------------------
# Pallas matmul kernels: bf16 operands, f32 accumulation, fused bias (+ReLU).
# ----------------------------------------------------------------------------
def _mm_bias_kernel(a_ref, b_ref, bias_ref, o_ref, *, relu):
    """Single-K-step variant: no scratch accumulator needed."""
    out = jnp.dot(a_ref[...], b_ref[...], preferred_element_type=jnp.float32)
    out = out + bias_ref[...]
    if relu:
        out = jnp.maximum(out, 0.0)
    o_ref[...] = out.astype(o_ref.dtype)


def _mm_bias_acc_kernel(a_ref, b_ref, bias_ref, o_ref, acc_ref, *, relu):
    """Multi-K-step variant with resident f32 accumulator."""
    @pl.when(pl.program_id(2) == 0)
    def _init():
        acc_ref[...] = jnp.zeros_like(acc_ref)

    acc_ref[...] += jnp.dot(a_ref[...], b_ref[...],
                            preferred_element_type=jnp.float32)

    @pl.when(pl.program_id(2) == pl.num_programs(2) - 1)
    def _finalize():
        out = acc_ref[...] + bias_ref[...]
        if relu:
            out = jnp.maximum(out, 0.0)
        o_ref[...] = out.astype(out.dtype).astype(o_ref.dtype)


def pallas_matmul(a, b, bias=None, *, relu=False,
                  out_dtype=jnp.bfloat16, compute_dtype=jnp.bfloat16):
    """Fused tiled matmul + bias + optional ReLU on the MXU.

    M is padded to a tile multiple (waste-bounded), N to a multiple of 128
    (lane-dense stores).  K is kept un-padded (full-extent block) whenever it
    fits comfortably in VMEM, which covers every matmul in this model.
    """
    M, K = a.shape
    K2, N = b.shape
    assert K == K2
    if bias is None:
        bias = jnp.zeros((N,), jnp.float32)
    bias = bias.astype(jnp.float32).reshape(1, N)

    # Degenerate tiny matmuls: launch overhead dominates; let XLA fuse it.
    if M * N * K <= (1 << 15):
        out = jnp.dot(a.astype(jnp.float32), b.astype(jnp.float32)) + bias
        if relu:
            out = jnp.maximum(out, 0.0)
        return out.astype(out_dtype)

    tm, Mp = _pick_tm(M)
    Np = _round_up(N, 128)
    tn = 256 if Np % 256 == 0 else 128
    tn = min(tn, Np)

    if K <= 2048:                       # full-extent K block, no HBM zero-pad
        Kp, tk = K, K
    else:
        Kp = _round_up(K, 128)
        tk = 512 if Kp % 512 == 0 else (256 if Kp % 256 == 0 else 128)

    # v7x: guarantee >=2 tiles on a "parallel" axis so both TCs get work.
    if (Mp // tm) * (Np // tn) == 1:
        if tm >= 16:
            tm //= 2
        elif tn > 128:
            tn //= 2

    grid_k = Kp // tk
    in_isz = jnp.dtype(compute_dtype).itemsize
    out_isz = jnp.dtype(out_dtype).itemsize

    a_p = jnp.pad(a.astype(compute_dtype), ((0, Mp - M), (0, Kp - K)))
    b_p = jnp.pad(b.astype(compute_dtype), ((0, Kp - K), (0, Np - N)))
    bias_p = jnp.pad(bias, ((0, 0), (0, Np - N)))

    vmem_need = (2 * tm * tk * in_isz + 2 * tk * tn * in_isz
                 + 2 * tm * tn * out_isz + tm * tn * 4 + 2 * tn * 4)
    vmem_limit = int(min(max(4 * vmem_need, 16 << 20), 56 << 20))

    cost = pl.CostEstimate(
        flops=int(2.0 * Mp * Np * Kp),
        transcendentals=0,
        bytes_accessed=int(Mp * Kp * in_isz + Kp * Np * in_isz
                           + Mp * Np * out_isz + Np * 4))

    if grid_k == 1:
        out = pl.pallas_call(
            functools.partial(_mm_bias_kernel, relu=relu),
            out_shape=jax.ShapeDtypeStruct((Mp, Np), out_dtype),
            grid_spec=pltpu.PrefetchScalarGridSpec(
                num_scalar_prefetch=0,
                grid=(Mp // tm, Np // tn),
                in_specs=[
                    pl.BlockSpec((tm, Kp), lambda i, j: (i, 0)),
                    pl.BlockSpec((Kp, tn), lambda i, j: (0, j)),
                    pl.BlockSpec((1, tn), lambda i, j: (0, j)),
                ],
                out_specs=pl.BlockSpec((tm, tn), lambda i, j: (i, j)),
            ),
            compiler_params=pltpu.CompilerParams(
                dimension_semantics=("parallel", "parallel"),
                vmem_limit_bytes=vmem_limit),
            cost_estimate=cost,
        )(a_p, b_p, bias_p)
    else:
        out = pl.pallas_call(
            functools.partial(_mm_bias_acc_kernel, relu=relu),
            out_shape=jax.ShapeDtypeStruct((Mp, Np), out_dtype),
            grid_spec=pltpu.PrefetchScalarGridSpec(
                num_scalar_prefetch=0,
                grid=(Mp // tm, Np // tn, grid_k),
                in_specs=[
                    pl.BlockSpec((tm, tk), lambda i, j, k: (i, k)),
                    pl.BlockSpec((tk, tn), lambda i, j, k: (k, j)),
                    pl.BlockSpec((1, tn), lambda i, j, k: (0, j)),
                ],
                out_specs=pl.BlockSpec((tm, tn), lambda i, j, k: (i, j)),
                scratch_shapes=[pltpu.VMEM((tm, tn), jnp.float32)],
            ),
            compiler_params=pltpu.CompilerParams(
                dimension_semantics=("parallel", "parallel", "arbitrary"),
                vmem_limit_bytes=vmem_limit),
            cost_estimate=cost,
        )(a_p, b_p, bias_p)
    return out[:M, :N]


# ----------------------------------------------------------------------------
# Fused bottleneck (3x3 conv + ReLU) + classifier (1x1 conv) kernel.
# ----------------------------------------------------------------------------
def _bottleneck_cls_kernel(a_ref, w1_ref, b1_ref, w2_ref, b2_ref, o_ref):
    y = jnp.dot(a_ref[...], w1_ref[...], preferred_element_type=jnp.float32)
    y = jnp.maximum(y + b1_ref[...], 0.0)                 # bottleneck ReLU
    z = jnp.dot(y.astype(w2_ref.dtype), w2_ref[...],
                preferred_element_type=jnp.float32)
    o_ref[...] = (z + b2_ref[...]).astype(o_ref.dtype)


def fused_bottleneck_classifier(x, w1_mat, b1, w2_mat, b2, *,
                                out_dtype=jnp.bfloat16):
    """out = relu(im2col3x3(x) @ W1 + b1) @ W2 + b2 in ONE pallas_call."""
    B = x.shape[0]
    patches, Ho, Wo = _im2col(x, 3, 1, 1)
    K1, C1 = w1_mat.shape
    _, N2 = w2_mat.shape
    a = patches.reshape(B * Ho * Wo, K1).astype(jnp.bfloat16)
    M = a.shape[0]

    tm, Mp = _pick_tm(M)
    if Mp // tm == 1 and tm >= 16:        # keep both v7x TCs busy
        tm //= 2
    Np2 = _round_up(N2, 128)              # lane-dense classifier output

    a_p = jnp.pad(a, ((0, Mp - M), (0, 0)))
    w1_p = w1_mat.astype(jnp.bfloat16)
    b1_p = b1.astype(jnp.float32).reshape(1, C1)
    w2_p = jnp.pad(w2_mat.astype(jnp.bfloat16), ((0, 0), (0, Np2 - N2)))
    b2_p = jnp.pad(b2.astype(jnp.float32).reshape(1, N2),
                   ((0, 0), (0, Np2 - N2)))

    cost = pl.CostEstimate(
        flops=int(2.0 * Mp * (K1 * C1 + C1 * Np2)),
        transcendentals=0,
        bytes_accessed=int(Mp * K1 * 2 + K1 * C1 * 2 + C1 * Np2 * 2
                           + Mp * Np2 * jnp.dtype(out_dtype).itemsize))

    out = pl.pallas_call(
        _bottleneck_cls_kernel,
        out_shape=jax.ShapeDtypeStruct((Mp, Np2), out_dtype),
        grid_spec=pltpu.PrefetchScalarGridSpec(
            num_scalar_prefetch=0,
            grid=(Mp // tm,),
            in_specs=[
                pl.BlockSpec((tm, K1), lambda i: (i, 0)),
                pl.BlockSpec((K1, C1), lambda i: (0, 0)),
                pl.BlockSpec((1, C1), lambda i: (0, 0)),
                pl.BlockSpec((C1, Np2), lambda i: (0, 0)),
                pl.BlockSpec((1, Np2), lambda i: (0, 0)),
            ],
            out_specs=pl.BlockSpec((tm, Np2), lambda i: (i, 0)),
        ),
        compiler_params=pltpu.CompilerParams(
            dimension_semantics=("parallel",),
            vmem_limit_bytes=int(48 << 20)),
        cost_estimate=cost,
    )(a_p, w1_p, b1_p, w2_p, b2_p)
    return out[:M, :N2].reshape(B, Ho, Wo, N2)


# ----------------------------------------------------------------------------
# Fused separable bilinear resize kernel (F.interpolate, align_corners=False).
# ----------------------------------------------------------------------------
def _resize_kernel(mh_ref, g_ref, x_ref, o_ref):
    t = jnp.dot(mh_ref[...], x_ref[0], preferred_element_type=jnp.float32)
    z = jnp.dot(t.astype(g_ref.dtype), g_ref[...],
                preferred_element_type=jnp.float32)
    o_ref[0] = z.astype(o_ref.dtype)


def bilinear_resize_pallas(x, Ho, Wo, *, out_dtype=jnp.float32):
    """Per-image fused separable resize: out[b] = Mh @ x[b] @ kron(Mw, I_C)^T.

    bf16 operands, f32 accumulation, no HBM transposes of the activation and
    no dense O(HoWoHiWi) kron on the data path.
    """
    B, Hi, Wi, C = x.shape
    mh = jnp.asarray(bilinear_matrix_1d(Ho, Hi), dtype=jnp.bfloat16)
    g = jnp.asarray(
        np.kron(bilinear_matrix_1d(Wo, Wi), np.eye(C, dtype=np.float32)).T,
        dtype=jnp.bfloat16)                                 # (Wi*C, Wo*C)
    x2 = x.reshape(B, Hi, Wi * C).astype(jnp.bfloat16)

    # TODO(synk): tile Ho for very large outputs (per-image output block must
    # fit VMEM); fine at PSP-head resolutions.
    out = pl.pallas_call(
        _resize_kernel,
        out_shape=jax.ShapeDtypeStruct((B, Ho, Wo * C), out_dtype),
        grid_spec=pltpu.PrefetchScalarGridSpec(
            num_scalar_prefetch=0,
            grid=(B,),
            in_specs=[
                pl.BlockSpec((Ho, Hi), lambda b: (0, 0)),
                pl.BlockSpec((Wi * C, Wo * C), lambda b: (0, 0)),
                pl.BlockSpec((1, Hi, Wi * C), lambda b: (b, 0, 0)),
            ],
            out_specs=pl.BlockSpec((1, Ho, Wo * C), lambda b: (b, 0, 0)),
        ),
        compiler_params=pltpu.CompilerParams(
            dimension_semantics=("parallel",),
            vmem_limit_bytes=int(48 << 20)),
        cost_estimate=pl.CostEstimate(
            flops=int(2.0 * B * (Ho * Hi * Wi * C + Ho * Wi * C * Wo * C)),
            transcendentals=0,
            bytes_accessed=int(B * Hi * Wi * C * 2 + B * Ho * Wo * C * 4)),
    )(mh, g, x2)
    return out.reshape(B, Ho, Wo, C)


# ----------------------------------------------------------------------------
# Conv glue: im2col with reflection padding (updatePadding -> ReflectionPad2d).
# ----------------------------------------------------------------------------
def _im2col(x, k, stride, pad):
    if pad > 0:
        assert pad < x.shape[1] and pad < x.shape[2], "reflect pad too large"
        x = jnp.pad(x, ((0, 0), (pad, pad), (pad, pad), (0, 0)), mode="reflect")
    B, Hp, Wp, C = x.shape
    Ho = (Hp - k) // stride + 1
    Wo = (Wp - k) // stride + 1
    cols = []
    for ky in range(k):
        for kx in range(k):
            cols.append(
                x[:, ky: ky + stride * (Ho - 1) + 1: stride,
                     kx: kx + stride * (Wo - 1) + 1: stride, :])
    patches = jnp.concatenate(cols, axis=-1)  # (B, Ho, Wo, k*k*C)
    return patches, Ho, Wo


def fused_dual_conv(x1, x2, w1_mat, b1, w2_mat, b2, *, k, stride, pad, relu):
    """rgb + depth trunk convs (same geometry) as ONE Pallas matmul: rows
    concatenated along M, weights along N (cross blocks discarded)."""
    cout = w1_mat.shape[1]
    p1, Ho, Wo = _im2col(x1, k, stride, pad)
    p2, _, _ = _im2col(x2, k, stride, pad)
    B = x1.shape[0]
    rows = B * Ho * Wo
    kk_cin = w1_mat.shape[0]
    a = jnp.concatenate([p1.reshape(rows, kk_cin),
                         p2.reshape(rows, kk_cin)], axis=0)
    wmat = jnp.concatenate([w1_mat, w2_mat], axis=1)
    bias = jnp.concatenate([b1, b2], axis=0)
    out = pallas_matmul(a, wmat, bias, relu=relu)          # (2*rows, 2*cout)
    y1 = out[:rows, :cout].reshape(B, Ho, Wo, cout)
    y2 = out[rows:, cout:].reshape(B, Ho, Wo, cout)
    return y1, y2


# ----------------------------------------------------------------------------
# Pooling / tiny-resize glue (launch-bound, stays on the VPU via jnp).
# ----------------------------------------------------------------------------
def adaptive_pool_matrix_1d(out_len, in_len):
    M = np.zeros((out_len, in_len), np.float32)
    for o in range(out_len):
        start = (o * in_len) // out_len
        end = -(-((o + 1) * in_len) // out_len)  # ceil
        M[o, start:end] = 1.0 / (end - start)
    return M


def adaptive_avg_pool(x, sh, sw):
    B, H, W, C = x.shape
    Ph = jnp.asarray(adaptive_pool_matrix_1d(sh, H))
    Pw = jnp.asarray(adaptive_pool_matrix_1d(sw, W))
    y = jnp.einsum("ph,bhwc->bpwc", Ph, x)
    y = jnp.einsum("qw,bpwc->bpqc", Pw, y)
    return y


def bilinear_matrix_1d(out_len, in_len):
    """align_corners=False bilinear resize as an (out_len, in_len) matrix."""
    scale = in_len / out_len
    i = np.arange(out_len, dtype=np.float64)
    x = (i + 0.5) * scale - 0.5
    x = np.clip(x, 0.0, in_len - 1)
    x0 = np.floor(x).astype(np.int64)
    x1 = np.minimum(x0 + 1, in_len - 1)
    w1 = x - x0
    w0 = 1.0 - w1
    M = np.zeros((out_len, in_len), np.float32)
    M[np.arange(out_len), x0] += w0
    M[np.arange(out_len), x1] += w1
    return M


def bilinear_resize_jnp(x, Ho, Wo):
    B, Hi, Wi, C = x.shape
    Mh = jnp.asarray(bilinear_matrix_1d(Ho, Hi))
    Mw = jnp.asarray(bilinear_matrix_1d(Wo, Wi))
    y = jnp.einsum("oh,bhwc->bowc", Mh, x)
    y = jnp.einsum("pw,bowc->bopc", Mw, y)
    return y


# ----------------------------------------------------------------------------
# Parameters: weights pre-reshaped to (K, N) matrices and pre-cast to bf16.
# ----------------------------------------------------------------------------
def _init_conv_mat(key, k, cin, cout):
    wkey, bkey = jax.random.split(key)
    w = jax.random.normal(wkey, (k * k * cin, cout), jnp.float32)
    w = w / math.sqrt(k * k * cin)
    b = 0.01 * jax.random.normal(bkey, (cout,), jnp.float32)
    return w.astype(jnp.bfloat16), b


def init_params(key, n_class=3, feat_ch=32, branch_ch=16):
    keys = jax.random.split(key, 10)

    # TODO(synk): the real EfficientNet-B0 trunk (MBConv blocks, BN, swish,
    # pretrained weights) has no clean self-contained equivalent; this trunk
    # keeps its role (reflection-padded stride-2 downsampling extractor).
    def trunk(k0, k1):
        w1, b1 = _init_conv_mat(k0, 3, 3, feat_ch // 2)
        w2, b2 = _init_conv_mat(k1, 3, feat_ch // 2, feat_ch)
        return dict(w1=w1, b1=b1, w2=w2, b2=b2)

    psp_size = 2 * feat_ch  # rgb + depth channel concat
    # Three 1x1 PSP branch convs pre-fused (weights concatenated along N).
    bw, bb = [], []
    for i in range(len(PSP_SIZES)):
        w, b = _init_conv_mat(keys[4 + i], 1, psp_size, branch_ch)
        bw.append(w)
        bb.append(b)
    w_branch = jnp.concatenate(bw, axis=1)
    b_branch = jnp.concatenate(bb, axis=0)

    w_bot, b_bot = _init_conv_mat(
        keys[8], 3, psp_size + branch_ch * len(PSP_SIZES), feat_ch)
    w_cls, b_cls = _init_conv_mat(keys[9], 1, feat_ch, n_class)

    return dict(
        rgb_trunk=trunk(keys[0], keys[1]),
        depth_trunk=trunk(keys[2], keys[3]),
        psp=dict(w_branch=w_branch, b_branch=b_branch,
                 w_bottle=w_bot, b_bottle=b_bot,
                 w_cls=w_cls, b_cls=b_cls),
    )


# ----------------------------------------------------------------------------
# Forward pass mirroring SuctionEffNetPSP.forward
# ----------------------------------------------------------------------------
def trunks_forward(p_rgb, p_ddd, rgb, ddd):
    x_rgb, x_ddd = fused_dual_conv(rgb, ddd,
                                   p_rgb["w1"], p_rgb["b1"],
                                   p_ddd["w1"], p_ddd["b1"],
                                   k=3, stride=2, pad=1, relu=True)
    x_rgb, x_ddd = fused_dual_conv(x_rgb, x_ddd,
                                   p_rgb["w2"], p_rgb["b2"],
                                   p_ddd["w2"], p_ddd["b2"],
                                   k=3, stride=2, pad=1, relu=True)
    return x_rgb, x_ddd


def psp_forward(p, x, out_size):
    # TODO(synk): full PSPNet head (dropout, multi-stage upsampling convs) is
    # reduced to the canonical PSP pyramid + bottleneck + classifier.
    B, H, W, C = x.shape
    n_branch = len(PSP_SIZES)
    branch_ch = p["w_branch"].shape[1] // n_branch

    # All PSP 1x1 branch convs fused into one matmul: pooled rows along M,
    # (pre-concatenated) branch weights along N.
    pooled = [adaptive_avg_pool(x, s, s) for s in PSP_SIZES]
    a = jnp.concatenate(
        [q.reshape(B * s * s, C) for q, s in zip(pooled, PSP_SIZES)], axis=0)
    fused = pallas_matmul(a, p["w_branch"], p["b_branch"], relu=False)

    branches = [x]
    row = 0
    for idx, s in enumerate(PSP_SIZES):
        rows = B * s * s
        conv = fused[row: row + rows,
                     idx * branch_ch: (idx + 1) * branch_ch]
        conv = conv.reshape(B, s, s, branch_ch)
        row += rows
        # tiny (<=4x4 -> HxW) branch upsample: launch-bound VPU glue
        branches.append(bilinear_resize_jnp(conv, H, W).astype(x.dtype))

    cat = jnp.concatenate(branches, axis=-1)
    # 3x3 bottleneck conv + ReLU + 1x1 classifier fused in one pallas_call.
    y = fused_bottleneck_classifier(cat, p["w_bottle"], p["b_bottle"],
                                    p["w_cls"], p["b_cls"])
    # F.interpolate(..., mode='bilinear') -> fused separable Pallas resize.
    return bilinear_resize_pallas(y, out_size[0], out_size[1],
                                  out_dtype=jnp.float32)


def suction_effnet_psp_forward(params, rgb_nchw, ddd_nchw, out_size):
    # NCHW -> NHWC; cast network inputs to bf16 once (halves im2col HBM slab).
    rgb = jnp.transpose(rgb_nchw, (0, 2, 3, 1)).astype(jnp.bfloat16)
    ddd = jnp.transpose(ddd_nchw, (0, 2, 3, 1)).astype(jnp.bfloat16)
    rgb_feature, depth_feature = trunks_forward(
        params["rgb_trunk"], params["depth_trunk"], rgb, ddd)
    rgbd_parallel = jnp.concatenate([rgb_feature, depth_feature], axis=-1)
    out = psp_forward(params["psp"], rgbd_parallel, out_size)
    return jnp.transpose(out, (0, 3, 1, 2))  # back to NCHW like PyTorch


# ----------------------------------------------------------------------------
if __name__ == "__main__":
    key = jax.random.PRNGKey(0)
    pkey, rkey, dkey = jax.random.split(key, 3)

    params = init_params(pkey, n_class=3)

    # Small shapes consistent with the module: NCHW rgb and depth inputs.
    rgb_input = jax.random.normal(rkey, (2, 3, 16, 16), jnp.float32)
    ddd_input = jax.random.normal(dkey, (2, 3, 16, 16), jnp.float32)

    fwd = jax.jit(suction_effnet_psp_forward, static_argnames=("out_size",))
    out = fwd(params, rgb_input, ddd_input, out_size=(16, 16))
    out = jax.block_until_ready(out)
    assert out.shape == (2, 3, 16, 16), out.shape
    assert bool(jnp.all(jnp.isfinite(out)))
    print("KERNEL_OK")
</pallas_src>

<mosaic_0001>
module attributes {stable_mosaic.version = 11 : i64} {
  func.func @_mm_bias_kernel(%arg0: i32, %arg1: i32, %arg2: memref<128x27xbf16, #tpu.memory_space<vmem>>, %arg3: memref<27x128xbf16, #tpu.memory_space<vmem>>, %arg4: memref<1x128xf32, #tpu.memory_space<vmem>>, %arg5: memref<128x128xbf16, #tpu.memory_space<vmem>>) attributes {dimension_semantics = [#tpu.dimension_semantics<parallel>, #tpu.dimension_semantics<parallel>], iteration_bounds = array<i64: 2, 1>, scalar_prefetch = 0 : i64, scratch_operands = 0 : i64, tpu.core_type = #tpu.core_type<tc>, window_params = [{transform_indices = @transform_0, window_bounds = array<i64: 128, 27>}, {transform_indices = @transform_1, window_bounds = array<i64: 27, 128>}, {transform_indices = @transform_2, window_bounds = array<i64: 1, 128>}, {transform_indices = @transform_3, window_bounds = array<i64: 128, 128>}]} {
    %c0 = arith.constant 0 : index
    %c0_0 = arith.constant 0 : index
    %0 = vector.load %arg2[%c0, %c0_0] : memref<128x27xbf16, #tpu.memory_space<vmem>>, vector<128x27xbf16>
    %c0_1 = arith.constant 0 : index
    %c0_2 = arith.constant 0 : index
    %1 = vector.load %arg3[%c0_1, %c0_2] : memref<27x128xbf16, #tpu.memory_space<vmem>>, vector<27x128xbf16>
    %cst = arith.constant dense<0.000000e+00> : vector<128x128xf32>
    %2 = tpu.matmul %0, %1, %cst {dimension_numbers = #tpu.dot_dimension_numbers<[1], [0], [0], [1], [0, 0, 1, 1], [], []>} : vector<128x27xbf16>, vector<27x128xbf16>, vector<128x128xf32> -> vector<128x128xf32>
    %c0_3 = arith.constant 0 : index
    %c0_4 = arith.constant 0 : index
    %3 = vector.load %arg4[%c0_3, %c0_4] : memref<1x128xf32, #tpu.memory_space<vmem>>, vector<1x128xf32>
    %4 = vector.broadcast %3 : vector<1x128xf32> to vector<128x128xf32>
    %5 = arith.addf %2, %4 : vector<128x128xf32>
    %cst_5 = arith.constant 0.000000e+00 : f32
    %6 = vector.broadcast %cst_5 : f32 to vector<128x128xf32>
    %7 = arith.maximumf %5, %6 : vector<128x128xf32>
    %8 = arith.truncf %7 : vector<128x128xf32> to vector<128x128xbf16>
    %c0_6 = arith.constant 0 : index
    %c0_7 = arith.constant 0 : index
    %9 = vector.load %arg5[%c0_6, %c0_7] : memref<128x128xbf16, #tpu.memory_space<vmem>>, vector<128x128xbf16>
    tpu.vector_store %arg5[%c0_6, %c0_7], %8 {strides = array<i32>} : memref<128x128xbf16, #tpu.memory_space<vmem>>, vector<128x128xbf16>,
    return
  }
  func.func @transform_0(%arg0: i32, %arg1: i32) -> (i32, i32) {
    %c0_i32 = arith.constant 0 : i32
    %c0_i32_0 = arith.constant 0 : i32
    return %arg0, %c0_i32 : i32, i32
  }
  func.func @transform_1(%arg0: i32, %arg1: i32) -> (i32, i32) {
    %c0_i32 = arith.constant 0 : i32
    %c0_i32_0 = arith.constant 0 : i32
    return %c0_i32, %arg1 : i32, i32
  }
  func.func @transform_2(%arg0: i32, %arg1: i32) -> (i32, i32) {
    %c0_i32 = arith.constant 0 : i32
    %c0_i32_0 = arith.constant 0 : i32
    return %c0_i32, %arg1 : i32, i32
  }
  func.func @transform_3(%arg0: i32, %arg1: i32) -> (i32, i32) {
    %c0_i32 = arith.constant 0 : i32
    return %arg0, %arg1 : i32, i32
  }
}

module attributes {stable_mosaic.version = 11 : i64} {
  func.func @_mm_bias_kernel(%arg0: i32, %arg1: i32, %arg2: memref<32x144xbf16, #tpu.memory_space<vmem>>, %arg3: memref<144x128xbf16, #tpu.memory_space<vmem>>, %arg4: memref<1x128xf32, #tpu.memory_space<vmem>>, %arg5: memref<32x128xbf16, #tpu.memory_space<vmem>>) attributes {dimension_semantics = [#tpu.dimension_semantics<parallel>, #tpu.dimension_semantics<parallel>], iteration_bounds = array<i64: 2, 1>, scalar_prefetch = 0 : i64, scratch_operands = 0 : i64, tpu.core_type = #tpu.core_type<tc>, window_params = [{transform_indices = @transform_0, window_bounds = array<i64: 32, 144>}, {transform_indices = @transform_1, window_bounds = array<i64: 144, 128>}, {transform_indices = @transform_2, window_bounds = array<i64: 1, 128>}, {transform_indices = @transform_3, window_bounds = array<i64: 32, 128>}]} {
    %c0 = arith.constant 0 : index
    %c0_0 = arith.constant 0 : index
    %0 = vector.load %arg2[%c0, %c0_0] : memref<32x144xbf16, #tpu.memory_space<vmem>>, vector<32x144xbf16>
    %c0_1 = arith.constant 0 : index
    %c0_2 = arith.constant 0 : index
    %1 = vector.load %arg3[%c0_1, %c0_2] : memref<144x128xbf16, #tpu.memory_space<vmem>>, vector<144x128xbf16>
    %cst = arith.constant dense<0.000000e+00> : vector<32x128xf32>
    %2 = tpu.matmul %0, %1, %cst {dimension_numbers = #tpu.dot_dimension_numbers<[1], [0], [0], [1], [0, 0, 1, 1], [], []>} : vector<32x144xbf16>, vector<144x128xbf16>, vector<32x128xf32> -> vector<32x128xf32>
    %c0_3 = arith.constant 0 : index
    %c0_4 = arith.constant 0 : index
    %3 = vector.load %arg4[%c0_3, %c0_4] : memref<1x128xf32, #tpu.memory_space<vmem>>, vector<1x128xf32>
    %4 = vector.broadcast %3 : vector<1x128xf32> to vector<32x128xf32>
    %5 = arith.addf %2, %4 : vector<32x128xf32>
    %cst_5 = arith.constant 0.000000e+00 : f32
    %6 = vector.broadcast %cst_5 : f32 to vector<32x128xf32>
    %7 = arith.maximumf %5, %6 : vector<32x128xf32>
    %8 = arith.truncf %7 : vector<32x128xf32> to vector<32x128xbf16>
    %c0_6 = arith.constant 0 : index
    %c0_7 = arith.constant 0 : index
    %9 = vector.load %arg5[%c0_6, %c0_7] : memref<32x128xbf16, #tpu.memory_space<vmem>>, vector<32x128xbf16>
    tpu.vector_store %arg5[%c0_6, %c0_7], %8 {strides = array<i32>} : memref<32x128xbf16, #tpu.memory_space<vmem>>, vector<32x128xbf16>,
    return
  }
  func.func @transform_0(%arg0: i32, %arg1: i32) -> (i32, i32) {
    %c0_i32 = arith.constant 0 : i32
    %c0_i32_0 = arith.constant 0 : i32
    return %arg0, %c0_i32 : i32, i32
  }
  func.func @transform_1(%arg0: i32, %arg1: i32) -> (i32, i32) {
    %c0_i32 = arith.constant 0 : i32
    %c0_i32_0 = arith.constant 0 : i32
    return %c0_i32, %arg1 : i32, i32
  }
  func.func @transform_2(%arg0: i32, %arg1: i32) -> (i32, i32) {
    %c0_i32 = arith.constant 0 : i32
    %c0_i32_0 = arith.constant 0 : i32
    return %c0_i32, %arg1 : i32, i32
  }
  func.func @transform_3(%arg0: i32, %arg1: i32) -> (i32, i32) {
    %c0_i32 = arith.constant 0 : i32
    return %arg0, %arg1 : i32, i32
  }
}

module attributes {stable_mosaic.version = 11 : i64} {
  func.func @_mm_bias_kernel(%arg0: i32, %arg1: i32, %arg2: memref<16x64xbf16, #tpu.memory_space<vmem>>, %arg3: memref<64x128xbf16, #tpu.memory_space<vmem>>, %arg4: memref<1x128xf32, #tpu.memory_space<vmem>>, %arg5: memref<16x128xbf16, #tpu.memory_space<vmem>>) attributes {dimension_semantics = [#tpu.dimension_semantics<parallel>, #tpu.dimension_semantics<parallel>], iteration_bounds = array<i64: 3, 1>, scalar_prefetch = 0 : i64, scratch_operands = 0 : i64, tpu.core_type = #tpu.core_type<tc>, window_params = [{transform_indices = @transform_0, window_bounds = array<i64: 16, 64>}, {transform_indices = @transform_1, window_bounds = array<i64: 64, 128>}, {transform_indices = @transform_2, window_bounds = array<i64: 1, 128>}, {transform_indices = @transform_3, window_bounds = array<i64: 16, 128>}]} {
    %c0 = arith.constant 0 : index
    %c0_0 = arith.constant 0 : index
    %0 = vector.load %arg2[%c0, %c0_0] : memref<16x64xbf16, #tpu.memory_space<vmem>>, vector<16x64xbf16>
    %c0_1 = arith.constant 0 : index
    %c0_2 = arith.constant 0 : index
    %1 = vector.load %arg3[%c0_1, %c0_2] : memref<64x128xbf16, #tpu.memory_space<vmem>>, vector<64x128xbf16>
    %cst = arith.constant dense<0.000000e+00> : vector<16x128xf32>
    %2 = tpu.matmul %0, %1, %cst {dimension_numbers = #tpu.dot_dimension_numbers<[1], [0], [0], [1], [0, 0, 1, 1], [], []>} : vector<16x64xbf16>, vector<64x128xbf16>, vector<16x128xf32> -> vector<16x128xf32>
    %c0_3 = arith.constant 0 : index
    %c0_4 = arith.constant 0 : index
    %3 = vector.load %arg4[%c0_3, %c0_4] : memref<1x128xf32, #tpu.memory_space<vmem>>, vector<1x128xf32>
    %4 = vector.broadcast %3 : vector<1x128xf32> to vector<16x128xf32>
    %5 = arith.addf %2, %4 : vector<16x128xf32>
    %6 = arith.truncf %5 : vector<16x128xf32> to vector<16x128xbf16>
    %c0_5 = arith.constant 0 : index
    %c0_6 = arith.constant 0 : index
    %7 = vector.load %arg5[%c0_5, %c0_6] : memref<16x128xbf16, #tpu.memory_space<vmem>>, vector<16x128xbf16>
    tpu.vector_store %arg5[%c0_5, %c0_6], %6 {strides = array<i32>} : memref<16x128xbf16, #tpu.memory_space<vmem>>, vector<16x128xbf16>,
    return
  }
  func.func @transform_0(%arg0: i32, %arg1: i32) -> (i32, i32) {
    %c0_i32 = arith.constant 0 : i32
    %c0_i32_0 = arith.constant 0 : i32
    return %arg0, %c0_i32 : i32, i32
  }
  func.func @transform_1(%arg0: i32, %arg1: i32) -> (i32, i32) {
    %c0_i32 = arith.constant 0 : i32
    %c0_i32_0 = arith.constant 0 : i32
    return %c0_i32, %arg1 : i32, i32
  }
  func.func @transform_2(%arg0: i32, %arg1: i32) -> (i32, i32) {
    %c0_i32 = arith.constant 0 : i32
    %c0_i32_0 = arith.constant 0 : i32
    return %c0_i32, %arg1 : i32, i32
  }
  func.func @transform_3(%arg0: i32, %arg1: i32) -> (i32, i32) {
    %c0_i32 = arith.constant 0 : i32
    return %arg0, %arg1 : i32, i32
  }
}

module attributes {stable_mosaic.version = 11 : i64} {
  func.func @_bottleneck_cls_kernel(%arg0: i32, %arg1: memref<16x1008xbf16, #tpu.memory_space<vmem>>, %arg2: memref<1008x32xbf16, #tpu.memory_space<vmem>>, %arg3: memref<1x32xf32, #tpu.memory_space<vmem>>, %arg4: memref<32x128xbf16, #tpu.memory_space<vmem>>, %arg5: memref<1x128xf32, #tpu.memory_space<vmem>>, %arg6: memref<16x128xbf16, #tpu.memory_space<vmem>>) attributes {dimension_semantics = [#tpu.dimension_semantics<parallel>], iteration_bounds = array<i64: 2>, scalar_prefetch = 0 : i64, scratch_operands = 0 : i64, tpu.core_type = #tpu.core_type<tc>, window_params = [{transform_indices = @transform_0, window_bounds = array<i64: 16, 1008>}, {pipeline_mode = #tpu.pipeline_mode<synchronous>, transform_indices = @transform_1, window_bounds = array<i64: 1008, 32>}, {pipeline_mode = #tpu.pipeline_mode<synchronous>, transform_indices = @transform_2, window_bounds = array<i64: 1, 32>}, {pipeline_mode = #tpu.pipeline_mode<synchronous>, transform_indices = @transform_3, window_bounds = array<i64: 32, 128>}, {pipeline_mode = #tpu.pipeline_mode<synchronous>, transform_indices = @transform_4, window_bounds = array<i64: 1, 128>}, {transform_indices = @transform_5, window_bounds = array<i64: 16, 128>}]} {
    %c0 = arith.constant 0 : index
    %c0_0 = arith.constant 0 : index
    %0 = vector.load %arg1[%c0, %c0_0] : memref<16x1008xbf16, #tpu.memory_space<vmem>>, vector<16x1008xbf16>
    %c0_1 = arith.constant 0 : index
    %c0_2 = arith.constant 0 : index
    %1 = vector.load %arg2[%c0_1, %c0_2] : memref<1008x32xbf16, #tpu.memory_space<vmem>>, vector<1008x32xbf16>
    %cst = arith.constant dense<0.000000e+00> : vector<16x32xf32>
    %2 = tpu.matmul %0, %1, %cst {dimension_numbers = #tpu.dot_dimension_numbers<[1], [0], [0], [1], [0, 0, 1, 1], [], []>} : vector<16x1008xbf16>, vector<1008x32xbf16>, vector<16x32xf32> -> vector<16x32xf32>
    %c0_3 = arith.constant 0 : index
    %c0_4 = arith.constant 0 : index
    %3 = vector.load %arg3[%c0_3, %c0_4] : memref<1x32xf32, #tpu.memory_space<vmem>>, vector<1x32xf32>
    %4 = vector.broadcast %3 : vector<1x32xf32> to vector<16x32xf32>
    %5 = arith.addf %2, %4 : vector<16x32xf32>
    %cst_5 = arith.constant 0.000000e+00 : f32
    %6 = vector.broadcast %cst_5 : f32 to vector<16x32xf32>
    %7 = arith.maximumf %5, %6 : vector<16x32xf32>
    %8 = arith.truncf %7 : vector<16x32xf32> to vector<16x32xbf16>
    %c0_6 = arith.constant 0 : index
    %c0_7 = arith.constant 0 : index
    %9 = vector.load %arg4[%c0_6, %c0_7] : memref<32x128xbf16, #tpu.memory_space<vmem>>, vector<32x128xbf16>
    %cst_8 = arith.constant dense<0.000000e+00> : vector<16x128xf32>
    %10 = tpu.matmul %8, %9, %cst_8 {dimension_numbers = #tpu.dot_dimension_numbers<[1], [0], [0], [1], [0, 0, 1, 1], [], []>} : vector<16x32xbf16>, vector<32x128xbf16>, vector<16x128xf32> -> vector<16x128xf32>
    %c0_9 = arith.constant 0 : index
    %c0_10 = arith.constant 0 : index
    %11 = vector.load %arg5[%c0_9, %c0_10] : memref<1x128xf32, #tpu.memory_space<vmem>>, vector<1x128xf32>
    %12 = vector.broadcast %11 : vector<1x128xf32> to vector<16x128xf32>
    %13 = arith.addf %10, %12 : vector<16x128xf32>
    %14 = arith.truncf %13 : vector<16x128xf32> to vector<16x128xbf16>
    %c0_11 = arith.constant 0 : index
    %c0_12 = arith.constant 0 : index
    %15 = vector.load %arg6[%c0_11, %c0_12] : memref<16x128xbf16, #tpu.memory_space<vmem>>, vector<16x128xbf16>
    tpu.vector_store %arg6[%c0_11, %c0_12], %14 {strides = array<i32>} : memref<16x128xbf16, #tpu.memory_space<vmem>>, vector<16x128xbf16>,
    return
  }
  func.func @transform_0(%arg0: i32) -> (i32, i32) {
    %c0_i32 = arith.constant 0 : i32
    %c0_i32_0 = arith.constant 0 : i32
    return %arg0, %c0_i32 : i32, i32
  }
  func.func @transform_1(%arg0: i32) -> (i32, i32) {
    %c0_i32 = arith.constant 0 : i32
    %c0_i32_0 = arith.constant 0 : i32
    %c0_i32_1 = arith.constant 0 : i32
    return %c0_i32, %c0_i32_0 : i32, i32
  }
  func.func @transform_2(%arg0: i32) -> (i32, i32) {
    %c0_i32 = arith.constant 0 : i32
    %c0_i32_0 = arith.constant 0 : i32
    %c0_i32_1 = arith.constant 0 : i32
    return %c0_i32, %c0_i32_0 : i32, i32
  }
  func.func @transform_3(%arg0: i32) -> (i32, i32) {
    %c0_i32 = arith.constant 0 : i32
    %c0_i32_0 = arith.constant 0 : i32
    %c0_i32_1 = arith.constant 0 : i32
    return %c0_i32, %c0_i32_0 : i32, i32
  }
  func.func @transform_4(%arg0: i32) -> (i32, i32) {
    %c0_i32 = arith.constant 0 : i32
    %c0_i32_0 = arith.constant 0 : i32
    %c0_i32_1 = arith.constant 0 : i32
    return %c0_i32, %c0_i32_0 : i32, i32
  }
  func.func @transform_5(%arg0: i32) -> (i32, i32) {
    %c0_i32 = arith.constant 0 : i32
    %c0_i32_0 = arith.constant 0 : i32
    return %arg0, %c0_i32 : i32, i32
  }
}

module attributes {stable_mosaic.version = 11 : i64} {
  func.func @_resize_kernel(%arg0: i32, %arg1: memref<16x4xbf16, #tpu.memory_space<vmem>>, %arg2: memref<12x48xbf16, #tpu.memory_space<vmem>>, %arg3: memref<1x4x12xbf16, #tpu.memory_space<vmem>>, %arg4: memref<1x16x48xf32, #tpu.memory_space<vmem>>) attributes {dimension_semantics = [#tpu.dimension_semantics<parallel>], iteration_bounds = array<i64: 2>, scalar_prefetch = 0 : i64, scratch_operands = 0 : i64, tpu.core_type = #tpu.core_type<tc>, window_params = [{pipeline_mode = #tpu.pipeline_mode<synchronous>, transform_indices = @transform_0, window_bounds = array<i64: 16, 4>}, {pipeline_mode = #tpu.pipeline_mode<synchronous>, transform_indices = @transform_1, window_bounds = array<i64: 12, 48>}, {transform_indices = @transform_2, window_bounds = array<i64: 1, 4, 12>}, {transform_indices = @transform_3, window_bounds = array<i64: 1, 16, 48>}]} {
    %c0 = arith.constant 0 : index
    %c0_0 = arith.constant 0 : index
    %0 = vector.load %arg1[%c0, %c0_0] : memref<16x4xbf16, #tpu.memory_space<vmem>>, vector<16x4xbf16>
    %c0_1 = arith.constant 0 : index
    %c0_2 = arith.constant 0 : index
    %c0_3 = arith.constant 0 : index
    %1 = vector.load %arg3[%c0_1, %c0_2, %c0_3] : memref<1x4x12xbf16, #tpu.memory_space<vmem>>, vector<1x4x12xbf16>
    %2 = vector.shape_cast %1 : vector<1x4x12xbf16> to vector<4x12xbf16>
    %cst = arith.constant dense<0.000000e+00> : vector<16x12xf32>
    %3 = tpu.matmul %0, %2, %cst {dimension_numbers = #tpu.dot_dimension_numbers<[1], [0], [0], [1], [0, 0, 1, 1], [], []>} : vector<16x4xbf16>, vector<4x12xbf16>, vector<16x12xf32> -> vector<16x12xf32>
    %4 = arith.truncf %3 : vector<16x12xf32> to vector<16x12xbf16>
    %c0_4 = arith.constant 0 : index
    %c0_5 = arith.constant 0 : index
    %5 = vector.load %arg2[%c0_4, %c0_5] : memref<12x48xbf16, #tpu.memory_space<vmem>>, vector<12x48xbf16>
    %cst_6 = arith.constant dense<0.000000e+00> : vector<16x48xf32>
    %6 = tpu.matmul %4, %5, %cst_6 {dimension_numbers = #tpu.dot_dimension_numbers<[1], [0], [0], [1], [0, 0, 1, 1], [], []>} : vector<16x12xbf16>, vector<12x48xbf16>, vector<16x48xf32> -> vector<16x48xf32>
    %c0_7 = arith.constant 0 : index
    %c0_8 = arith.constant 0 : index
    %c0_9 = arith.constant 0 : index
    %7 = vector.load %arg4[%c0_7, %c0_8, %c0_9] : memref<1x16x48xf32, #tpu.memory_space<vmem>>, vector<1x16x48xf32>
    %8 = vector.shape_cast %7 : vector<1x16x48xf32> to vector<16x48xf32>
    %9 = vector.shape_cast %6 : vector<16x48xf32> to vector<1x16x48xf32>
    tpu.vector_store %arg4[%c0_7, %c0_8, %c0_9], %9 {strides = array<i32>} : memref<1x16x48xf32, #tpu.memory_space<vmem>>, vector<1x16x48xf32>,
    return
  }
  func.func @transform_0(%arg0: i32) -> (i32, i32) {
    %c0_i32 = arith.constant 0 : i32
    %c0_i32_0 = arith.constant 0 : i32
    %c0_i32_1 = arith.constant 0 : i32
    return %c0_i32, %c0_i32_0 : i32, i32
  }
  func.func @transform_1(%arg0: i32) -> (i32, i32) {
    %c0_i32 = arith.constant 0 : i32
    %c0_i32_0 = arith.constant 0 : i32
    %c0_i32_1 = arith.constant 0 : i32
    return %c0_i32, %c0_i32_0 : i32, i32
  }
  func.func @transform_2(%arg0: i32) -> (i32, i32, i32) {
    %c0_i32 = arith.constant 0 : i32
    %c0_i32_0 = arith.constant 0 : i32
    %c0_i32_1 = arith.constant 0 : i32
    return %arg0, %c0_i32, %c0_i32_0 : i32, i32, i32
  }
  func.func @transform_3(%arg0: i32) -> (i32, i32, i32) {
    %c0_i32 = arith.constant 0 : i32
    %c0_i32_0 = arith.constant 0 : i32
    %c0_i32_1 = arith.constant 0 : i32
    return %arg0, %c0_i32, %c0_i32_0 : i32, i32, i32
  }
}

</mosaic_0001>

<bundles_post_ra>
// kernel: suction_effnet_psp_forward.5
= control target key start
LH: loop header
LB: loop body
LE: loop exit
PB: predicated region body
PF: predicated region fallthrough
CT: control target
= control target key end

     0   :  { %s856_s12 = smov 0   ;;  %s858_s13 = smov 0   ;;  %s923_s0 = inlined_call_operand.vmem [shape: bf16[256,27], index: 0, kind: input, shape index: {}]   ;;  %s924_s1 = inlined_call_operand.vmem [shape: bf16[27,128], index: 1, kind: input, shape index: {}]   ;;  %s925_s2 = inlined_call_operand.vmem [shape: f32[1,128], index: 2, kind: input, shape index: {}]   ;;  %s926_s3 = inlined_call_operand.vmem [shape: bf16[256,128], index: 3, kind: output, shape index: {}]  }
   0x1   :  { %s860_s14 = smov 0  }
   0x2 LB: > { %s25_s15 = sadd.s32 1, %s829_s13  ;;  %p637_p0 = scmp.ge.s32.totalorder %s833_s14, 1  ;;  %s833_s14 = sphi %s860_s14, %s13_s14   ;;  %s829_s13 = sphi %s858_s13, %s928_s13   ;;  %s825_s12 = sphi %s856_s12, %s927_s12  }
   0x3   : > { %p27_p1 = scmp.ge.s32.totalorder %s25_s15, 2  ;;  %p169_p2 = scmp.lt.s32.totalorder %s833_s14, 3 }
   0x5   : > { %s930_s15 = smov (%p27_p1, %s25_s15), 0  ;;  %p170_p3 = pnand %p637_p0, %p169_p2 }
   0x6   : > { %v801_v0 = vld [vmem:[%s924_s1] sm:$0xff] (!%p170_p3)   ;;  %vm329_vm0 = vcmask (!%p170_p3), 1044480   ;;  %v802_v1 = vld [vmem:[%s924_s1 + $0x8] sm:$0x3f] (!%p170_p3)   ;;  %vm330_vm1 = vcmask (!%p170_p3), 1045504   ;;  %s638_s20 = sshll.u32 (!%p170_p3), %s825_s12, 4 }
   0x7   : > { %173 = sbr.rel (%p170_p3) target bundleno = 250 (0xfa), region = 32  ;;  %752 = vmatprep.subr.bf16.mxu0 (!%p170_p3), %v801_v0  ;;  %772 = vmatprep.subr.bf16.mxu1 (!%p170_p3), %v801_v0  ;;  %v835_v2 = vmov (!%p170_p3), 65535   ;;  %p204_p4 = scmp.lt.s32.totalorder (!%p170_p3), %s638_s20, 31  ;;  %vm304_vm2 = vcmask (!%p170_p3), 220160   ;;  %v642_v14 = vld [vmem:[%s925_s2] ss:$0 sm:$0xff] (!%p170_p3) }
   0x8   : > { %753 = vmatpush3.bf16.msra.mxu0 (!%p170_p3), %v801_v0  ;;  %774 = vmatpush3.bf16.msra.mxu1 (!%p170_p3), %v801_v0  ;;  %v331_v3 = vsel (!%p170_p3), %vm329_vm0, 4294967295, %v835_v2 }
   0x9   : > { %v332_v4 = vsel (!%p170_p3), %vm330_vm1, %v331_v3, 0 }
   0xa   : > { %v334_v5 = vand.u32 (!%p170_p3), %v802_v1, %v332_v4 }
   0xc   : > { %754 = vmatprep.subr.bf16.mxu0 (!%p170_p3), %v334_v5  ;;  %773 = vmatprep.subr.bf16.mxu1 (!%p170_p3), %v334_v5 }
   0xd   : > { %755 = vmatpush3.bf16.msra.mxu0 (!%p170_p3), %v334_v5  ;;  %775 = vmatpush3.bf16.msra.mxu1 (!%p170_p3), %v334_v5 }
   0xe   : > { %s932_s20 = smov (!%p204_p4, %s638_s20), 31 }
   0xf   : > { %s639_s21 = sshll.u32 %s932_s20, 2 }
  0x10   : > { %s207_s24 = scalar_lea.vmem %s923_s0, %s639_s21  ;;  %s904_s29 = scalar_lea.vmem %s926_s3, %s639_s21 }
  0x11   : > { %v803_v6 = vld [vmem:[%s207_s24] sm:$0xff]   ;;  %v805_v8 = vld [vmem:[%s207_s24 + $0x8] sm:$0xff]   ;;  %v807_v10 = vld [vmem:[%s207_s24 + $0x10] sm:$0xff]  }
  0x12   : > { %v804_v7 = vld [vmem:[%s207_s24 + $0x20] sm:$0xff]   ;;  %756 = vmatprep.mubr.msk.bf16.mxu0 %vm304_vm2, %v803_v6  ;;  %v806_v9 = vld [vmem:[%s207_s24 + $0x28] sm:$0xff]   ;;  %v808_v11 = vld [vmem:[%s207_s24 + $0x30] sm:$0xff]  }
  0x13   : > { %764 = vmatprep.mubr.msk.bf16.mxu1 %vm304_vm2, %v804_v7  ;;  %757 = vmatmul.mubr.msk.bf16.vlgmr.msra.gmra.mrb[0].mxu0 %vm304_vm2, %v805_v8  ;;  %v809_v12 = vld [vmem:[%s207_s24 + $0x18] sm:$0xff]  }
  0x14   : > { %765 = vmatmul.mubr.msk.bf16.vlgmr.msra.gmra.mrb[0].mxu1 %vm304_vm2, %v806_v9  ;;  %760 = vmatprep.mubr.msk.bf16.mxu0 %vm304_vm2, %v807_v10  ;;  %v810_v13 = vld [vmem:[%s207_s24 + $0x38] sm:$0xff]  }
  0x15   : > { %768 = vmatprep.mubr.msk.bf16.mxu1 %vm304_vm2, %v808_v11 }
  0x1b   : > { %761 = vmatmul.mubr.msk.bf16.gmra.mrb[4].mxu0 %vm304_vm2, %v809_v12 }
  0x1c   : > { %769 = vmatmul.mubr.msk.bf16.gmra.mrb[4].mxu1 %vm304_vm2, %v810_v13 }
  0xe6   : > { %v758_v15 = vpop.f32.mrb[0].mxu0 }
  0xe7   : > { %v379_v16 = vadd.f32 %v758_v15, %v642_v14  ;;  %v766_v17 = vpop.f32.mrb[0].mxu1  ;;  %v370_v18 = vpop.f32.mrb[1].mxu0 }
  0xe8   : > { %v411_v19 = vadd.f32 %v766_v17, %v642_v14  ;;  %v371_v20 = vadd.f32 %v642_v14, %v370_v18  ;;  %v402_v21 = vpop.f32.mrb[1].mxu1  ;;  %v759_v22 = vpop.f32.mrb[2].mxu0 }
  0xe9   : > { %v403_v23 = vadd.f32 %v642_v14, %v402_v21  ;;  %v382_v24 = vadd.f32 %v759_v22, %v642_v14  ;;  %v767_v25 = vpop.f32.mrb[2].mxu1  ;;  %v373_v26 = vpop.f32.mrb[3].mxu0  ;;  %v435_v30 = vmax.f32 %v379_v16, 0.0 }
  0xea   : > { %v414_v27 = vadd.f32 %v767_v25, %v642_v14  ;;  %v374_v28 = vadd.f32 %v642_v14, %v373_v26  ;;  %v405_v29 = vpop.f32.mrb[3].mxu1  ;;  %v443_v33 = vmax.f32 %v411_v19, 0.0  ;;  %v433_v34 = vmax.f32 %v371_v20, 0.0 }
  0xeb   : > { %v436_v31 = vmax.f32 %v382_v24, 0.0  ;;  %v406_v32 = vadd.f32 %v642_v14, %v405_v29  ;;  %v441_v37 = vmax.f32 %v403_v23, 0.0 }
  0xec   : > { %v444_v35 = vmax.f32 %v414_v27, 0.0  ;;  %v434_v36 = vmax.f32 %v374_v28, 0.0 }
  0xed   : > { %v703_v38 = vpack.c.bf16 %v436_v31, %v435_v30  ;;  %v442_v39 = vmax.f32 %v406_v32, 0.0 }
  0xee   : > { %v723_v40 = vpack.c.bf16 %v444_v35, %v443_v33  ;;  %v698_v41 = vpack.c.bf16 %v434_v36, %v433_v34  ;;  %v762_v42 = vpop.f32.mrb[4].mxu0 }
  0xef   : > { %735 = vst [vmem:[%s904_s29 + $0x8] sm:$0xff] %v703_v38   ;;  %v718_v43 = vpack.c.bf16 %v442_v39, %v441_v37  ;;  %v395_v44 = vadd.f32 %v762_v42, %v642_v14  ;;  %v770_v45 = vpop.f32.mrb[4].mxu1  ;;  %v386_v46 = vpop.f32.mrb[5].mxu0 }
  0xf0   : > { %739 = vst [vmem:[%s904_s29 + $0x28] sm:$0xff] %v723_v40   ;;  %699 = vst [vmem:[%s904_s29] sm:$0xff] %v698_v41   ;;  %v427_v47 = vadd.f32 %v770_v45, %v642_v14  ;;  %v387_v48 = vadd.f32 %v642_v14, %v386_v46  ;;  %v418_v49 = vpop.f32.mrb[5].mxu1  ;;  %v763_v50 = vpop.f32.mrb[6].mxu0 }
  0xf1   : > { %738 = vst [vmem:[%s904_s29 + $0x20] sm:$0xff] %v718_v43   ;;  %v419_v51 = vadd.f32 %v642_v14, %v418_v49  ;;  %v398_v52 = vadd.f32 %v763_v50, %v642_v14  ;;  %v771_v53 = vpop.f32.mrb[6].mxu1  ;;  %v389_v54 = vpop.f32.mrb[7].mxu0  ;;  %v439_v58 = vmax.f32 %v395_v44, 0.0 }
  0xf2   : > { %v430_v55 = vadd.f32 %v771_v53, %v642_v14  ;;  %v390_v56 = vadd.f32 %v642_v14, %v389_v54  ;;  %v421_v57 = vpop.f32.mrb[7].mxu1  ;;  %v447_v61 = vmax.f32 %v427_v47, 0.0  ;;  %v437_v62 = vmax.f32 %v387_v48, 0.0 }
  0xf3   : > { %v440_v59 = vmax.f32 %v398_v52, 0.0  ;;  %v422_v60 = vadd.f32 %v642_v14, %v421_v57  ;;  %v445_v1 = vmax.f32 %v419_v51, 0.0 }
  0xf4   : > { %v448_v63 = vmax.f32 %v430_v55, 0.0  ;;  %v438_v0 = vmax.f32 %v390_v56, 0.0 }
  0xf5   : > { %v713_v2 = vpack.c.bf16 %v440_v59, %v439_v58  ;;  %v446_v3 = vmax.f32 %v422_v60, 0.0 }
  0xf6   : > { %v733_v4 = vpack.c.bf16 %v448_v63, %v447_v61  ;;  %v708_v5 = vpack.c.bf16 %v438_v0, %v437_v62 }
  0xf7   : > { %737 = vst [vmem:[%s904_s29 + $0x18] sm:$0xff] %v713_v2   ;;  %v728_v6 = vpack.c.bf16 %v446_v3, %v445_v1 }
  0xf8   : > { %741 = vst [vmem:[%s904_s29 + $0x38] sm:$0xff] %v733_v4   ;;  %736 = vst [vmem:[%s904_s29 + $0x10] sm:$0xff] %v708_v5  }
  0xf9   : > { %740 = vst [vmem:[%s904_s29 + $0x30] sm:$0xff] %v728_v6  }
  0xfa PF: > { %s13_s14 = sadd.s32 1, %s833_s14   ;;  %s927_s12 = smov %s829_s13 }
  0xfb   : > { %p10_p5 = scmp.ge.s32.totalorder %s13_s14, 4   ;;  %s928_s13 = smov %s930_s15 }
  0xfd   :  { %12 = sbr.rel (!%p10_p5) target bundleno = 2 (0x2), region = 68 }

// kernel: suction_effnet_psp_forward.6
= control target key start
LH: loop header
LB: loop body
LE: loop exit
PB: predicated region body
PF: predicated region fallthrough
CT: control target
= control target key end

     0   :  { %s665_s12 = smov 0   ;;  %s667_s13 = smov 0   ;;  %s738_s0 = inlined_call_operand.vmem [shape: bf16[64,144], index: 0, kind: input, shape index: {}]   ;;  %s739_s1 = inlined_call_operand.vmem [shape: bf16[144,128], index: 1, kind: input, shape index: {}]   ;;  %s740_s2 = inlined_call_operand.vmem [shape: f32[1,128], index: 2, kind: input, shape index: {}]   ;;  %s741_s3 = inlined_call_operand.vmem [shape: bf16[64,128], index: 3, kind: output, shape index: {}]  }
   0x1   :  { %s669_s14 = smov 0  }
   0x2 LB: > { %s25_s15 = sadd.s32 1, %s638_s13  ;;  %p518_p0 = scmp.ge.s32.totalorder %s642_s14, 1  ;;  %s642_s14 = sphi %s669_s14, %s13_s14   ;;  %s638_s13 = sphi %s667_s13, %s743_s13   ;;  %s634_s12 = sphi %s665_s12, %s742_s12  }
   0x3   : > { %p27_p1 = scmp.ge.s32.totalorder %s25_s15, 2  ;;  %p170_p2 = scmp.lt.s32.totalorder %s642_s14, 3 }
   0x5   : > { %s745_s15 = smov (%p27_p1, %s25_s15), 0  ;;  %p171_p3 = pnand %p518_p0, %p170_p2 }
   0x6   : > { %v605_v0 = vld [vmem:[%s739_s1] sm:$0xff] (!%p171_p3)   ;;  %v644_v1 = vmov (!%p171_p3), 0   ;;  %s519_s18 = sshll.u32 (!%p171_p3), %s634_s12, 2  ;;  %v606_v2 = vld [vmem:[%s739_s1 + $0x8] sm:$0xff] (!%p171_p3)   ;;  %v607_v3 = vld [vmem:[%s739_s1 + $0x10] sm:$0xff] (!%p171_p3)   ;;  %vm330_vm0 = vcmask (!%p171_p3), 130048  }
   0x7   : > { %174 = sbr.rel (%p171_p3) target bundleno = 264 (0x108), region = 32  ;;  %337 = vmatprep.subr.bf16.mxu0 (!%p171_p3), %v644_v1  ;;  %562 = vmatprep.subr.bf16.mxu1 (!%p171_p3), %v644_v1  ;;  %p206_p4 = scmp.lt.s32.totalorder (!%p171_p3), %s519_s18, 7  ;;  %v608_v4 = vld [vmem:[%s739_s1 + $0x18] sm:$0xff] (!%p171_p3)   ;;  %v609_v7 = vld [vmem:[%s739_s1 + $0x20] sm:$0xff] (!%p171_p3)   ;;  %v610_v8 = vld [vmem:[%s739_s1 + $0x28] sm:$0xff] (!%p171_p3)  }
   0x8   : > { %338 = vmatpush1.bf16.msra.mxu0 (!%p171_p3), %v605_v0  ;;  %571 = vmatpush1.bf16.msra.mxu1 (!%p171_p3), %v605_v0  ;;  %v611_v9 = vld [vmem:[%s739_s1 + $0x30] sm:$0xff] (!%p171_p3)   ;;  %v612_v10 = vld [vmem:[%s739_s1 + $0x38] sm:$0xff] (!%p171_p3)   ;;  %v613_v11 = vld [vmem:[%s739_s1 + $0x40] sm:$0xff] (!%p171_p3)  }
   0x9   : > { %339 = vmatprep.subr.bf16.mxu0 (!%p171_p3), %v644_v1  ;;  %563 = vmatprep.subr.bf16.mxu1 (!%p171_p3), %v644_v1  ;;  %v524_v14 = vld [vmem:[%s740_s2] ss:$0 sm:$0xff] (!%p171_p3) }
   0xc   : > { %340 = vmatpush1.bf16.msra.mxu0 (!%p171_p3), %v606_v2  ;;  %572 = vmatpush1.bf16.msra.mxu1 (!%p171_p3), %v606_v2 }
   0xd   : > { %341 = vmatprep.subr.bf16.mxu0 (!%p171_p3), %v644_v1  ;;  %564 = vmatprep.subr.bf16.mxu1 (!%p171_p3), %v644_v1 }
   0xe   : > { %s747_s18 = smov (!%p206_p4, %s519_s18), 7 }
   0xf   : > { %s546_s23 = sshll.u32 %s747_s18, 3  ;;  %s523_s17 = sshll.u32 %s747_s18, 2 }
  0x10   : > { %s698_s26 = scalar_lea.vmem %s738_s0, %s546_s23  ;;  %342 = vmatpush1.bf16.msra.mxu0 %v607_v3  ;;  %573 = vmatpush1.bf16.msra.mxu1 %v607_v3  ;;  %s226_s21 = scalar_lea.vmem %s741_s3, %s523_s17 }
  0x11   : > { %v616_v5 = vld [vmem:[%s698_s26 + $0x4] ss:$8 sps:$4 sm:$0xff]   ;;  %343 = vmatprep.subr.bf16.mxu0 %v644_v1  ;;  %565 = vmatprep.subr.bf16.mxu1 %v644_v1  ;;  %v619_v6 = vld [vmem:[%s698_s26 + $0x14] ss:$8 sps:$4 sm:$0xff]   ;;  %v614_v12 = vld [vmem:[%s698_s26] ss:$8 sps:$4 sm:$0xff]  }
  0x12   : > { %538 = vmatprep.mubr.msk.bf16.mxu0 %vm330_vm0, %v616_v5  ;;  %539 = vmatprep.mubr.msk.bf16.mxu1 %vm330_vm0, %v619_v6  ;;  %v617_v13 = vld [vmem:[%s698_s26 + $0x10] ss:$8 sps:$4 sm:$0xff]  }
  0x14   : > { %344 = vmatpush1.bf16.msra.mxu0 %v608_v4  ;;  %574 = vmatpush1.bf16.msra.mxu1 %v608_v4 }
  0x15   : > { %345 = vmatprep.subr.bf16.mxu0 %v644_v1  ;;  %566 = vmatprep.subr.bf16.mxu1 %v644_v1 }
  0x18   : > { %346 = vmatpush1.bf16.msra.mxu0 %v609_v7  ;;  %575 = vmatpush1.bf16.msra.mxu1 %v609_v7 }
  0x19   : > { %347 = vmatprep.subr.bf16.mxu0 %v644_v1  ;;  %567 = vmatprep.subr.bf16.mxu1 %v644_v1 }
  0x1c   : > { %348 = vmatpush1.bf16.msra.mxu0 %v610_v8  ;;  %576 = vmatpush1.bf16.msra.mxu1 %v610_v8 }
  0x1d   : > { %349 = vmatprep.subr.bf16.mxu0 %v644_v1  ;;  %568 = vmatprep.subr.bf16.mxu1 %v644_v1 }
  0x20   : > { %350 = vmatpush1.bf16.msra.mxu0 %v611_v9  ;;  %577 = vmatpush1.bf16.msra.mxu1 %v611_v9 }
  0x21   : > { %351 = vmatprep.subr.bf16.mxu0 %v644_v1  ;;  %569 = vmatprep.subr.bf16.mxu1 %v644_v1 }
  0x24   : > { %352 = vmatpush1.bf16.msra.mxu0 %v612_v10  ;;  %578 = vmatpush1.bf16.msra.mxu1 %v612_v10 }
  0x25   : > { %353 = vmatprep.subr.bf16.mxu0 %v644_v1  ;;  %570 = vmatprep.subr.bf16.mxu1 %v644_v1 }
  0x28   : > { %354 = vmatpush1.bf16.msra.mxu0 %v613_v11  ;;  %579 = vmatpush1.bf16.msra.mxu1 %v613_v11 }
  0x2b   : > { %370 = vmatmul.mubr.bf16.vlgmr.msra.gmra.mrb[0].mxu0 %v614_v12  ;;  %378 = vmatmul.mubr.bf16.vlgmr.msra.gmra.mrb[0].mxu1 %v617_v13 }
  0xfe   : > { %v371_v15 = vpop.f32.mrb[0].mxu0  ;;  %v379_v16 = vpop.f32.mrb[0].mxu1 }
  0xff   : > { %v372_v17 = vadd.f32 %v524_v14, %v371_v15  ;;  %v380_v18 = vadd.f32 %v524_v14, %v379_v16  ;;  %v373_v19 = vpop.f32.mrb[1].mxu0  ;;  %v381_v20 = vpop.f32.mrb[1].mxu1 }
 0x100   : > { %v374_v21 = vpop.f32.mrb[2].mxu0  ;;  %v382_v22 = vpop.f32.mrb[2].mxu1 }
 0x101   : > { %v388_v23 = vmax.f32 %v380_v18, 0.0  ;;  %v375_v24 = vadd.f32 %v524_v14, %v374_v21  ;;  %v383_v25 = vadd.f32 %v524_v14, %v382_v22  ;;  %v376_v26 = vpop.f32.mrb[3].mxu0  ;;  %v384_v27 = vpop.f32.mrb[3].mxu1  ;;  %v386_v28 = vmax.f32 %v372_v17, 0.0 }
 0x103   : > { %v387_v29 = vmax.f32 %v375_v24, 0.0  ;;  %v389_v30 = vmax.f32 %v383_v25, 0.0 }
 0x105   : > { %v554_v31 = vpack.c.bf16 %v387_v29, %v386_v28  ;;  %v559_v32 = vpack.c.bf16 %v389_v30, %v388_v23 }
 0x107   : > { %555 = vst [vmem:[%s226_s21] sm:$0xff] %v554_v31   ;;  %561 = vst [vmem:[%s226_s21 + $0x8] sm:$0xff] %v559_v32  }
 0x108 PF: > { %s13_s14 = sadd.s32 1, %s642_s14   ;;  %s742_s12 = smov %s638_s13 }
 0x109   : > { %p10_p5 = scmp.ge.s32.totalorder %s13_s14, 4   ;;  %s743_s13 = smov %s745_s15 }
 0x10b   :  { %12 = sbr.rel (!%p10_p5) target bundleno = 2 (0x2), region = 68 }

// kernel: suction_effnet_psp_forward.7
= control target key start
LH: loop header
LB: loop body
LE: loop exit
PB: predicated region body
PF: predicated region fallthrough
CT: control target
= control target key end

     0   :  { %s552_s12 = smov 0   ;;  %s554_s13 = smov 0   ;;  %s600_s0 = inlined_call_operand.vmem [shape: bf16[48,64], index: 0, kind: input, shape index: {}]   ;;  %s601_s1 = inlined_call_operand.vmem [shape: bf16[64,128], index: 1, kind: input, shape index: {}]   ;;  %s602_s2 = inlined_call_operand.vmem [shape: f32[1,128], index: 2, kind: input, shape index: {}]   ;;  %s603_s3 = inlined_call_operand.vmem [shape: bf16[48,128], index: 3, kind: output, shape index: {}]  }
   0x1   :  { %s556_s14 = smov 0  }
   0x2 LB: > { %s25_s15 = sadd.s32 1, %s524_s13  ;;  %p435_p0 = scmp.ge.s32.totalorder %s528_s14, 1  ;;  %s528_s14 = sphi %s556_s14, %s13_s14   ;;  %s524_s13 = sphi %s554_s13, %s605_s13   ;;  %s520_s12 = sphi %s552_s12, %s604_s12  }
   0x3   : > { %p27_p1 = scmp.ge.s32.totalorder %s25_s15, 3  ;;  %p169_p2 = scmp.lt.s32.totalorder %s528_s14, 4 }
   0x5   : > { %s607_s15 = smov (%p27_p1, %s25_s15), 0  ;;  %p170_p3 = pnand %p435_p0, %p169_p2 }
   0x6   : > { %v501_v0 = vld [vmem:[%s601_s1] sm:$0xff] (!%p170_p3)   ;;  %v530_v1 = vmov (!%p170_p3), 0.0   ;;  %v502_v2 = vld [vmem:[%s601_s1 + $0x8] sm:$0xff] (!%p170_p3)   ;;  %vm531_vm0 = vmmov (!%p170_p3), 0   ;;  %s436_s20 = sshll.u32 (!%p170_p3), %s520_s12, 1  ;;  %v503_v3 = vld [vmem:[%s601_s1 + $0x10] sm:$0xff] (!%p170_p3)  }
   0x7   : > { %173 = sbr.rel (%p170_p3) target bundleno = 242 (0xf2), region = 32  ;;  %463 = vmatprep.subr.bf16.mxu0 (!%p170_p3), %v530_v1  ;;  %471 = vmatprep.mubr.msk.bf16.mxu0 (!%p170_p3), %vm531_vm0, %v530_v1  ;;  %p204_p4 = scmp.lt.s32.totalorder (!%p170_p3), %s436_s20, 5  ;;  %v504_v4 = vld [vmem:[%s601_s1 + $0x18] sm:$0xff] (!%p170_p3)   ;;  %vm272_vm1 = vcmask (!%p170_p3), 523264   ;;  %v440_v6 = vld [vmem:[%s602_s2] ss:$0 sm:$0xff] (!%p170_p3) }
   0x8   : > { %464 = vmatpush3.bf16.msra.mxu0 (!%p170_p3), %v501_v0 }
   0x9   : > { %465 = vmatprep.subr.bf16.mxu0 (!%p170_p3), %v530_v1 }
   0xc   : > { %466 = vmatpush3.bf16.msra.mxu0 (!%p170_p3), %v502_v2 }
   0xd   : > { %467 = vmatprep.subr.bf16.mxu0 (!%p170_p3), %v530_v1 }
   0xe   : > { %s609_s20 = smov (!%p204_p4, %s436_s20), 5 }
   0xf   : > { %s437_s23 = sshll.u32 %s609_s20, 2 }
  0x10   : > { %s207_s26 = scalar_lea.vmem %s600_s0, %s437_s23  ;;  %468 = vmatpush3.bf16.msra.mxu0 %v503_v3  ;;  %s223_s6 = scalar_lea.vmem %s603_s3, %s437_s23 }
  0x11   : > { %469 = vmatprep.subr.bf16.mxu0 %v530_v1  ;;  %v505_v5 = vld [vmem:[%s207_s26] sm:$0xff]  }
  0x14   : > { %470 = vmatpush3.bf16.msra.mxu0 %v504_v4 }
  0x17   : > { %472 = vmatmul.mubr.msk.bf16.vlgmr.msra.gmra.mrb[0].mxu0 %vm272_vm1, %v505_v5 }
  0xea   : > { %v310_v7 = vpop.f32.mrb[0].mxu0 }
  0xeb   : > { %v473_v8 = vpop.f32.mrb[1].mxu0  ;;  %v311_v10 = vadd.f32 %v440_v6, %v310_v7 }
  0xec   : > { %v313_v9 = vpop.f32.mrb[2].mxu0 }
  0xed   : > { %v314_v11 = vadd.f32 %v440_v6, %v313_v9  ;;  %v474_v12 = vpop.f32.mrb[3].mxu0 }
  0xef   : > { %v456_v13 = vpack.c.bf16 %v314_v11, %v311_v10 }
  0xf1   : > { %457 = vst [vmem:[%s223_s6] sm:$0xff] %v456_v13  }
  0xf2 PF: > { %s13_s14 = sadd.s32 1, %s528_s14   ;;  %s604_s12 = smov %s524_s13 }
  0xf3   : > { %p10_p5 = scmp.ge.s32.totalorder %s13_s14, 5   ;;  %s605_s13 = smov %s607_s15 }
  0xf5   :  { %12 = sbr.rel (!%p10_p5) target bundleno = 2 (0x2), region = 68 }

// kernel: suction_effnet_psp_forward.9
= control target key start
LH: loop header
LB: loop body
LE: loop exit
PB: predicated region body
PF: predicated region fallthrough
CT: control target
= control target key end

     0   :  { %s414_s12 = smov 0   ;;  %s437_s0 = inlined_call_operand.vmem [shape: bf16[16,4], index: 0, kind: input, shape index: {}]   ;;  %s438_s1 = inlined_call_operand.vmem [shape: bf16[12,48], index: 1, kind: input, shape index: {}]   ;;  %s439_s2 = inlined_call_operand.vmem [shape: bf16[2,4,12], index: 2, kind: input, shape index: {}]   ;;  %s440_s3 = inlined_call_operand.vmem [shape: f32[2,16,48], index: 3, kind: output, shape index: {}]  }
   0x1 LB: > { %s341_s13 = sadd.s32 4294967295, %s390_s12   ;;  %p345_p0 = scmp.ge.s32.totalorder %s390_s12, 1  ;;  %s390_s12 = sphi %s414_s12, %s13_s12  }
   0x2   : > { %p136_p1 = scmp.lt.s32.totalorder %s390_s12, 3 }
   0x4   : > { %p137_p2 = pnand %p345_p0, %p136_p1 }
   0x5   : > { %p159_p3 = scmp.lt.s32.totalorder (!%p137_p2), %s341_s13, 1  ;;  %v392_v0 = vmov (!%p137_p2), 0.0   ;;  %vm393_vm0 = vmmov (!%p137_p2), 0   ;;  %vm181_vm1 = vcmask (!%p137_p2), 1041408   ;;  %v382_v3 = vld [vmem:[%s437_s0] sm:$0xff] (!%p137_p2)   ;;  %vm177_vm2 = vcmask (!%p137_p2), 31744  }
   0x6   : > { %140 = sbr.rel (%p137_p2) target bundleno = 452 (0x1c4), region = 32  ;;  %360 = vmatprep.subr.bf16.mxu0 (!%p137_p2), %v392_v0  ;;  %362 = vmatprep.mubr.msk.bf16.mxu0 (!%p137_p2), %vm393_vm0, %v392_v0  ;;  %v383_v4 = vld [vmem:[%s438_s1] sm:$0x3f] (!%p137_p2)   ;;  %vm238_vm3 = vcmask (!%p137_p2), 1045504   ;;  %vm234_vm4 = vcmask (!%p137_p2), 97280   ;;  %vm283_vm5 = vcmask (!%p137_p2), 392192  }
   0x7   : > { %366 = vmatprep.subr.bf16.mxu1 (!%p137_p2), %v392_v0  ;;  %368 = vmatprep.mubr.msk.bf16.mxu1 (!%p137_p2), %vm393_vm0, %v392_v0  ;;  %v240_v5 = vsel (!%p137_p2), %vm238_vm3, %v383_v4, 0 }
   0x8   : > { %367 = vmatpush3.bf16.msra.mxu1 (!%p137_p2), %v240_v5 }
   0xd   : > { %s442_s13 = smov (!%p159_p3, %s341_s13), 1 }
   0xe   : > { %s346_s14 = sshll.u32 %s442_s13, 1  ;;  %s355_s22 = sshll.u32 %s442_s13, 4 }
   0xf   : > { %s162_s17 = scalar_lea.vmem %s439_s2, %s346_s14  ;;  %s167_s25 = scalar_lea.vmem %s440_s3, %s355_s22 }
  0x10   : > { %v171_v1 = vld [vmem:[%s162_s17] sm:$0x3] }
  0x11   : > { %v183_v2 = vsel %vm181_vm1, %v171_v1, 0 }
  0x12   : > { %361 = vmatpush3.bf16.msra.mxu0 %v183_v2 }
  0x15   : > { %363 = vmatmul.mubr.msk.bf16.vlgmr.msra.gmra.mrb[0].mxu0 %vm177_vm2, %v382_v3 }
  0xe8   : > { %v219_v6 = vpop.f32.mrb[0].mxu0 }
  0xe9   : > { %v364_v7 = vpop.f32.mrb[1].mxu0 }
  0xea   : > { %v222_v8 = vpop.f32.mrb[2].mxu0 }
  0xeb   : > { %v226_v9 = vpack.c.bf16 %v222_v8, %v219_v6  ;;  %v365_v10 = vpop.f32.mrb[3].mxu0 }
  0xed   : > { %369 = vmatmul.mubr.msk.bf16.vlgmr.msra.gmra.mrb[0].mxu1 %vm234_vm4, %v226_v9 }
 0x1c0   : > { %v276_v11 = vpop.f32.mrb[0].mxu1 }
 0x1c1   : > { %284 = vst.msk [vmem:[%s167_s25] sm:$0xff] %vm283_vm5, %v276_v11  ;;  %v370_v12 = vpop.f32.mrb[1].mxu1 }
 0x1c2   : > { %v279_v13 = vpop.f32.mrb[2].mxu1 }
 0x1c3   : > { %285 = vst.msk [vmem:[%s167_s25 + $0x8] sm:$0xff] %vm283_vm5, %v279_v13  ;;  %v371_v14 = vpop.f32.mrb[3].mxu1 }
 0x1c4 PF: > { %s13_s12 = sadd.s32 1, %s390_s12  }
 0x1c5   : > { %p10_p4 = scmp.ge.s32.totalorder %s13_s12, 4  }
 0x1c7   :  { %12 = sbr.rel (!%p10_p4) target bundleno = 1 (0x1), region = 62 }

// kernel: suction_effnet_psp_forward.8
= control target key start
LH: loop header
LB: loop body
LE: loop exit
PB: predicated region body
PF: predicated region fallthrough
CT: control target
= control target key end

     0   :  { %s1388_s18 = smov 0   ;;  %s1637_s0 = inlined_call_operand.vmem [shape: bf16[32,1008], index: 0, kind: input, shape index: {}]   ;;  %s1638_s1 = inlined_call_operand.vmem [shape: bf16[1008,32], index: 1, kind: input, shape index: {}]   ;;  %s1639_s2 = inlined_call_operand.vmem [shape: f32[1,32], index: 2, kind: input, shape index: {}]   ;;  %s1640_s3 = inlined_call_operand.vmem [shape: bf16[32,128], index: 3, kind: input, shape index: {}]   ;;  %s1641_s4 = inlined_call_operand.vmem [shape: f32[1,128], index: 4, kind: input, shape index: {}]   ;;  %s1642_s5 = inlined_call_operand.vmem [shape: bf16[32,128], index: 5, kind: output, shape index: {}]  }
   0x1 LB: > { %s1095_s19 = sadd.s32 4294967295, %s1353_s18   ;;  %p1099_p0 = scmp.ge.s32.totalorder %s1353_s18, 1  ;;  %s1353_s18 = sphi %s1388_s18, %s15_s18  }
   0x2   : > { %p189_p1 = scmp.lt.s32.totalorder %s1353_s18, 3 }
   0x4   : > { %p190_p2 = pnand %p1099_p0, %p189_p1 }
   0x5   : > { %v1282_v0 = vld [vmem:[%s1638_s1 + $0x40] sm:$0xff] (!%p190_p2)   ;;  %v1286_v4 = vld [vmem:[%s1638_s1 + $0x48] sm:$0xff] (!%p190_p2)   ;;  %v1290_v8 = vld [vmem:[%s1638_s1 + $0x50] sm:$0xff] (!%p190_p2)   ;;  %s1100_s29 = sshll.u32 (!%p190_p2), %s1095_s19, 1  ;;  %v1355_v41 = vmov (!%p190_p2), 0   ;;  %vm790_vm0 = vcmask (!%p190_p2), 916480  }
   0x6   : > { %193 = sbr.rel (%p190_p2) target bundleno = 539 (0x21b), region = 40  ;;  %v1283_v1 = vld [vmem:[%s1638_s1 + $0xc0] sm:$0xff] (!%p190_p2)   ;;  %1194 = vmatprep.subr.bf16.mxu0 (!%p190_p2), %v1282_v0  ;;  %v1287_v5 = vld [vmem:[%s1638_s1 + $0xc8] sm:$0xff] (!%p190_p2)   ;;  %v1291_v9 = vld [vmem:[%s1638_s1 + $0xd0] sm:$0xff] (!%p190_p2)   ;;  %p219_p3 = scmp.lt.s32.totalorder (!%p190_p2), %s1100_s29, 3  ;;  %vm1357_vm1 = vmmov (!%p190_p2), 0  }
   0x7   : > { %v1284_v2 = vld [vmem:[%s1638_s1] sm:$0xff] (!%p190_p2)   ;;  %1216 = vmatprep.subr.bf16.mxu1 (!%p190_p2), %v1283_v1  ;;  %v1288_v6 = vld [vmem:[%s1638_s1 + $0x8] sm:$0xff] (!%p190_p2)   ;;  %v1292_v10 = vld [vmem:[%s1638_s1 + $0x10] sm:$0xff] (!%p190_p2)   ;;  %vm984_vm2 = vcmask (!%p190_p2), 261120  }
   0x8   : > { %v1285_v3 = vld [vmem:[%s1638_s1 + $0x80] sm:$0xff] (!%p190_p2)   ;;  %1195 = vmatpush3.bf16.msra.mxu0 (!%p190_p2), %v1284_v2  ;;  %v1289_v7 = vld [vmem:[%s1638_s1 + $0x88] sm:$0xff] (!%p190_p2)   ;;  %v1293_v11 = vld [vmem:[%s1638_s1 + $0x90] sm:$0xff] (!%p190_p2)  }
   0x9   : > { %1217 = vmatpush3.bf16.msra.mxu1 (!%p190_p2), %v1285_v3  ;;  %1196 = vmatprep.subr.bf16.mxu0 (!%p190_p2), %v1286_v4  ;;  %v1294_v12 = vld [vmem:[%s1638_s1 + $0x58] sm:$0xff] (!%p190_p2)   ;;  %v1298_v16 = vld [vmem:[%s1638_s1 + $0x60] sm:$0xff] (!%p190_p2)   ;;  %v1302_v20 = vld [vmem:[%s1638_s1 + $0x68] sm:$0xff] (!%p190_p2)  }
   0xa   : > { %1218 = vmatprep.subr.bf16.mxu1 (!%p190_p2), %v1287_v5  ;;  %v1295_v13 = vld [vmem:[%s1638_s1 + $0xd8] sm:$0xff] (!%p190_p2)   ;;  %v1299_v17 = vld [vmem:[%s1638_s1 + $0xe0] sm:$0xff] (!%p190_p2)   ;;  %v1303_v21 = vld [vmem:[%s1638_s1 + $0xe8] sm:$0xff] (!%p190_p2)  }
   0xb   : > { %v1296_v14 = vld [vmem:[%s1638_s1 + $0x18] sm:$0xff] (!%p190_p2)   ;;  %v1300_v18 = vld [vmem:[%s1638_s1 + $0x20] sm:$0xff] (!%p190_p2)   ;;  %v1304_v22 = vld [vmem:[%s1638_s1 + $0x28] sm:$0xff] (!%p190_p2)  }
   0xc   : > { %1197 = vmatpush3.bf16.msra.mxu0 (!%p190_p2), %v1288_v6  ;;  %v1297_v15 = vld [vmem:[%s1638_s1 + $0x98] sm:$0xff] (!%p190_p2)   ;;  %v1301_v19 = vld [vmem:[%s1638_s1 + $0xa0] sm:$0xff] (!%p190_p2)   ;;  %v1305_v23 = vld [vmem:[%s1638_s1 + $0xa8] sm:$0xff] (!%p190_p2)  }
   0xd   : > { %1219 = vmatpush3.bf16.msra.mxu1 %v1289_v7  ;;  %1198 = vmatprep.subr.bf16.mxu0 %v1290_v8  ;;  %s1644_s29 = smov (!%p219_p3, %s1100_s29), 3  ;;  %v1306_v24 = vld [vmem:[%s1638_s1 + $0x70] sm:$0xff]   ;;  %v1310_v28 = vld [vmem:[%s1638_s1 + $0x78] sm:$0xff]   ;;  %v1314_v40 = vld [vmem:[%s1638_s1 + $0x140] sm:$0xff]  }
   0xe   : > { %1220 = vmatprep.subr.bf16.mxu1 %v1291_v9  ;;  %v1307_v25 = vld [vmem:[%s1638_s1 + $0xf0] sm:$0xff]   ;;  %s1186_s28 = sshll.u32 %s1644_s29, 5  ;;  %v1311_v29 = vld [vmem:[%s1638_s1 + $0xf8] sm:$0xff]   ;;  %v1315_v42 = vld [vmem:[%s1638_s1 + $0x100] sm:$0xff]   ;;  %s1104_s22 = sshll.u32 %s1644_s29, 2 }
   0xf   : > { %v1308_v26 = vld [vmem:[%s1638_s1 + $0x30] sm:$0xff]   ;;  %s1494_s19 = scalar_lea.vmem %s1637_s0, %s1186_s28  ;;  %v1312_v30 = vld [vmem:[%s1638_s1 + $0x38] sm:$0xff]   ;;  %v1316_v43 = vld [vmem:[%s1638_s1 + $0x180] sm:$0xff]   ;;  %s229_s25 = scalar_lea.vmem %s1642_s5, %s1104_s22 }
  0x10   : > { %1199 = vmatpush3.bf16.msra.mxu0 %v1292_v10  ;;  %v1309_v27 = vld [vmem:[%s1638_s1 + $0xb0] sm:$0xff]   ;;  %v1313_v31 = vld [vmem:[%s1638_s1 + $0xb8] sm:$0xff]   ;;  %v232_v32 = vld [vmem:[%s1494_s19] sm:$0xff] }
  0x11   : > { %1221 = vmatpush3.bf16.msra.mxu1 %v1293_v11  ;;  %1200 = vmatprep.subr.bf16.mxu0 %v1294_v12  ;;  %v236_v33 = vld [vmem:[%s1494_s19 + $0x20] sm:$0xff]  ;;  %v233_v34 = vld [vmem:[%s1494_s19 + $0x8] sm:$0xff]  ;;  %v1320_v47 = vld [vmem:[%s1638_s1 + $0x150] sm:$0xff]  }
  0x12   : > { %1222 = vmatprep.subr.bf16.mxu1 %v1295_v13  ;;  %v1106_v35 = vcombine.low %v232_v32, %v236_v33  ;;  %v1107_v36 = vcombine.high %v232_v32, %v236_v33  ;;  %v237_v37 = vld [vmem:[%s1494_s19 + $0x28] sm:$0xff]  ;;  %v1321_v48 = vld [vmem:[%s1638_s1 + $0x110] sm:$0xff]   ;;  %v1323_v50 = vld [vmem:[%s1638_s1 + $0x158] sm:$0xff]  }
  0x13   : > { %v1108_v38 = vcombine.low %v233_v34, %v237_v37  ;;  %v1109_v39 = vcombine.high %v233_v34, %v237_v37  ;;  %v1317_v44 = vld [vmem:[%s1638_s1 + $0x148] sm:$0xff]   ;;  %v1322_v49 = vld [vmem:[%s1638_s1 + $0x190] sm:$0xff]   ;;  %v1324_v51 = vld [vmem:[%s1638_s1 + $0x118] sm:$0xff]  }
  0x14   : > { %1201 = vmatpush3.bf16.msra.mxu0 %v1296_v14  ;;  %826 = vmatprep.mubr.bf16.mxu0 %v1107_v36  ;;  %v1318_v45 = vld [vmem:[%s1638_s1 + $0x108] sm:$0xff]   ;;  %v1325_v52 = vld [vmem:[%s1638_s1 + $0x198] sm:$0xff]   ;;  %v1326_v53 = vld [vmem:[%s1638_s1 + $0x160] sm:$0xff]  }
  0x15   : > { %1223 = vmatpush3.bf16.msra.mxu1 %v1297_v15  ;;  %1202 = vmatprep.subr.bf16.mxu0 %v1298_v16  ;;  %v1319_v46 = vld [vmem:[%s1638_s1 + $0x188] sm:$0xff]   ;;  %v1327_v54 = vld [vmem:[%s1638_s1 + $0x120] sm:$0xff]   ;;  %v1332_v59 = vld [vmem:[%s1638_s1 + $0x170] sm:$0xff]  }
  0x16   : > { %1224 = vmatprep.subr.bf16.mxu1 %v1299_v17  ;;  %867 = vmatprep.mubr.bf16.mxu1 %v1109_v39  ;;  %v1328_v55 = vld [vmem:[%s1638_s1 + $0x1a0] sm:$0xff]   ;;  %v1329_v56 = vld [vmem:[%s1638_s1 + $0x168] sm:$0xff]   ;;  %v1333_v60 = vld [vmem:[%s1638_s1 + $0x130] sm:$0xff]   ;;  %v1356_v17 = vmov 0.0  }
  0x17   : > { %v1330_v57 = vld [vmem:[%s1638_s1 + $0x128] sm:$0xff]   ;;  %v234_v61 = vld [vmem:[%s1494_s19 + $0x10] sm:$0xff]  ;;  %v1335_v1 = vld [vmem:[%s1638_s1 + $0x178] sm:$0xff]  }
  0x18   : > { %1203 = vmatpush3.bf16.msra.mxu0 %v1300_v18  ;;  %v1331_v58 = vld [vmem:[%s1638_s1 + $0x1a8] sm:$0xff]   ;;  %v238_v62 = vld [vmem:[%s1494_s19 + $0x30] sm:$0xff]  ;;  %v1336_v2 = vld [vmem:[%s1638_s1 + $0x138] sm:$0xff]  }
  0x19   : > { %1225 = vmatpush3.bf16.msra.mxu1 %v1301_v19  ;;  %1204 = vmatprep.subr.bf16.mxu0 %v1302_v20  ;;  %v1334_v63 = vld [vmem:[%s1638_s1 + $0x1b0] sm:$0xff]   ;;  %v1111_v0 = vcombine.high %v234_v61, %v238_v62  ;;  %v1337_v3 = vld [vmem:[%s1638_s1 + $0x1b8] sm:$0xff]   ;;  %v1338_v4 = vld [vmem:[%s1638_s1 + $0x1c0] sm:$0xff]   ;;  %v1110_v5 = vcombine.low %v234_v61, %v238_v62 }
  0x1a   : > { %1226 = vmatprep.subr.bf16.mxu1 %v1303_v21  ;;  %v235_v6 = vld [vmem:[%s1494_s19 + $0x18] sm:$0xff]  ;;  %v1339_v9 = vld [vmem:[%s1638_s1 + $0x1c8] sm:$0xff]   ;;  %v1340_v10 = vld [vmem:[%s1638_s1 + $0x1d0] sm:$0xff]  }
  0x1b   : > { %v239_v7 = vld [vmem:[%s1494_s19 + $0x38] sm:$0xff]  ;;  %v1342_v12 = vld [vmem:[%s1638_s1 + $0x1e0] sm:$0xff]   ;;  %v1343_v13 = vld [vmem:[%s1638_s1 + $0x1e8] sm:$0xff]  }
  0x1c   : > { %1205 = vmatpush3.bf16.msra.mxu0 %v1304_v22  ;;  %v1113_v8 = vcombine.high %v235_v6, %v239_v7  ;;  %v1341_v11 = vld [vmem:[%s1638_s1 + $0x1d8] sm:$0xff]   ;;  %v1344_v14 = vld [vmem:[%s1638_s1 + $0x1f0] sm:$0xff]   ;;  %v1112_v15 = vcombine.low %v235_v6, %v239_v7  ;;  %v1345_v16 = vld [vmem:[%s1640_s3] sm:$0xff]  }
  0x1d   : > { %1227 = vmatpush3.bf16.msra.mxu1 %v1305_v23  ;;  %1206 = vmatprep.subr.bf16.mxu0 %v1306_v24  ;;  %v1346_v18 = vld [vmem:[%s1640_s3 + $0x8] sm:$0xff]   ;;  %v1105_v21 = vld [vmem:[%s1639_s2] ss:$0 sm:$0xff] }
  0x1e   : > { %1228 = vmatprep.subr.bf16.mxu1 %v1307_v25 }
  0x20   : > { %1207 = vmatpush3.bf16.msra.mxu0 %v1308_v26 }
  0x21   : > { %1229 = vmatpush3.bf16.msra.mxu1 %v1309_v27  ;;  %1208 = vmatprep.subr.bf16.mxu0 %v1310_v28 }
  0x22   : > { %1230 = vmatprep.subr.bf16.mxu1 %v1311_v29 }
  0x24   : > { %1209 = vmatpush3.bf16.msra.mxu0 %v1312_v30 }
  0x25   : > { %1231 = vmatpush3.bf16.msra.mxu1 %v1313_v31  ;;  %1238 = vmatprep.subr.bf16.mxu0 %v1314_v40 }
  0x26   : > { %917 = vmatprep.subr.bf16.mxu1 %v1355_v41 }
  0x27   : > { %827 = vmatmul.mubr.bf16.vlgmr.msra.gmra.mrb[0].mxu0 %v1106_v35 }
  0x28   : > { %868 = vmatmul.mubr.bf16.vlgmr.msra.gmra.mrb[0].mxu1 %v1108_v38  ;;  %1239 = vmatpush3.bf16.msra.mxu0 %v1315_v42 }
  0x29   : > { %918 = vmatpush1.bf16.msra.mxu1 %v1316_v43  ;;  %1240 = vmatprep.subr.bf16.mxu0 %v1317_v44 }
  0x2a   : > { %919 = vmatprep.subr.bf16.mxu1 %v1355_v41  ;;  %908 = vmatprep.mubr.bf16.mxu0 %v1111_v0 }
  0x2b   : > { %1177 = vmatprep.mubr.msk.bf16.mxu1 %vm790_vm0, %v1113_v8 }
  0x2c   : > { %1241 = vmatpush3.bf16.msra.mxu0 %v1318_v45 }
  0x2d   : > { %920 = vmatpush1.bf16.msra.mxu1 %v1319_v46  ;;  %1242 = vmatprep.subr.bf16.mxu0 %v1320_v47 }
  0x2e   : > { %921 = vmatprep.subr.bf16.mxu1 %v1355_v41 }
  0x30   : > { %1243 = vmatpush3.bf16.msra.mxu0 %v1321_v48 }
  0x31   : > { %922 = vmatpush1.bf16.msra.mxu1 %v1322_v49  ;;  %1244 = vmatprep.subr.bf16.mxu0 %v1323_v50 }
  0x32   : > { %923 = vmatprep.subr.bf16.mxu1 %v1355_v41 }
  0x34   : > { %1245 = vmatpush3.bf16.msra.mxu0 %v1324_v51 }
  0x35   : > { %924 = vmatpush1.bf16.msra.mxu1 %v1325_v52  ;;  %1246 = vmatprep.subr.bf16.mxu0 %v1326_v53  ;;  %v1178_v53 = vld [vmem:[%s1641_s4] ss:$0 sm:$0xff] }
  0x36   : > { %925 = vmatprep.subr.bf16.mxu1 %v1355_v41 }
  0x38   : > { %1247 = vmatpush3.bf16.msra.mxu0 %v1327_v54 }
  0x39   : > { %926 = vmatpush1.bf16.msra.mxu1 %v1328_v55  ;;  %1248 = vmatprep.subr.bf16.mxu0 %v1329_v56 }
  0x3a   : > { %927 = vmatprep.subr.bf16.mxu1 %v1355_v41 }
  0x3c   : > { %1249 = vmatpush3.bf16.msra.mxu0 %v1330_v57 }
  0x3d   : > { %928 = vmatpush1.bf16.msra.mxu1 %v1331_v58  ;;  %1250 = vmatprep.subr.bf16.mxu0 %v1332_v59 }
  0x3e   : > { %929 = vmatprep.subr.bf16.mxu1 %v1355_v41 }
  0x40   : > { %1251 = vmatpush3.bf16.msra.mxu0 %v1333_v60 }
  0x41   : > { %930 = vmatpush1.bf16.msra.mxu1 %v1334_v63  ;;  %1252 = vmatprep.subr.bf16.mxu0 %v1335_v1 }
  0x42   : > { %931 = vmatprep.subr.bf16.mxu1 %v1355_v41 }
  0x44   : > { %1253 = vmatpush3.bf16.msra.mxu0 %v1336_v2 }
  0x45   : > { %932 = vmatpush1.bf16.msra.mxu1 %v1337_v3  ;;  %1263 = vmatprep.subr.bf16.mxu0 %v1356_v17 }
  0x46   : > { %933 = vmatprep.subr.bf16.mxu1 %v1355_v41 }
  0x47   : > { %909 = vmatmul.mubr.bf16.vlgmr.msra.gmra.mrb[4].mxu0 %v1110_v5 }
  0x48   : > { %1264 = vmatpush3.bf16.msra.mxu0 %v1345_v16  ;;  %1267 = vmatprep.mubr.msk.bf16.mxu0 %vm1357_vm1, %v1356_v17 }
  0x49   : > { %934 = vmatpush1.bf16.msra.mxu1 %v1338_v4  ;;  %1265 = vmatprep.subr.bf16.mxu0 %v1356_v17 }
  0x4a   : > { %935 = vmatprep.subr.bf16.mxu1 %v1355_v41 }
  0x4c   : > { %1266 = vmatpush3.bf16.msra.mxu0 %v1346_v18 }
  0x4d   : > { %936 = vmatpush1.bf16.msra.mxu1 %v1339_v9 }
  0x4e   : > { %937 = vmatprep.subr.bf16.mxu1 %v1355_v41 }
  0x51   : > { %938 = vmatpush1.bf16.msra.mxu1 %v1340_v10 }
  0x52   : > { %939 = vmatprep.subr.bf16.mxu1 %v1355_v41 }
  0x55   : > { %940 = vmatpush1.bf16.msra.mxu1 %v1341_v11 }
  0x56   : > { %941 = vmatprep.subr.bf16.mxu1 %v1355_v41 }
  0x59   : > { %942 = vmatpush1.bf16.msra.mxu1 %v1342_v12 }
  0x5a   : > { %943 = vmatprep.subr.bf16.mxu1 %v1355_v41 }
  0x5d   : > { %944 = vmatpush1.bf16.msra.mxu1 %v1343_v13 }
  0x5e   : > { %945 = vmatprep.subr.bf16.mxu1 %v1355_v41 }
  0x61   : > { %946 = vmatpush1.bf16.msra.mxu1 %v1344_v14 }
  0x64   : > { %950 = vmatmul.mubr.bf16.vlgmr.msra.gmra.mrb[4].mxu1 %v1112_v15 }
  0xfa   : > { %v1210_v19 = vpop.f32.mrb[0].mxu0 }
  0xfb   : > { %v1232_v20 = vpop.f32.mrb[0].mxu1  ;;  %v1211_v22 = vpop.f32.mrb[1].mxu0 }
  0xfc   : > { %v1212_v23 = vadd.f32 %v1211_v22, %v1210_v19  ;;  %v1233_v24 = vpop.f32.mrb[1].mxu1  ;;  %v1213_v25 = vpop.f32.mrb[2].mxu0 }
  0xfd   : > { %v1234_v26 = vadd.f32 %v1233_v24, %v1232_v20  ;;  %v1235_v27 = vpop.f32.mrb[2].mxu1  ;;  %v1214_v28 = vpop.f32.mrb[3].mxu0 }
  0xfe   : > { %v829_v29 = vadd.f32 %v1212_v23, %v1105_v21  ;;  %v1215_v30 = vadd.f32 %v1214_v28, %v1213_v25  ;;  %v1236_v31 = vpop.f32.mrb[3].mxu1 }
  0xff   : > { %v1237_v32 = vadd.f32 %v1236_v31, %v1235_v27 }
 0x100   : > { %v870_v33 = vadd.f32 %v1234_v26, %v829_v29  ;;  %v832_v34 = vadd.f32 %v1215_v30, %v1105_v21 }
 0x102   : > { %v873_v35 = vadd.f32 %v1237_v32, %v832_v34 }
 0x11a   : > { %v1254_v36 = vpop.f32.mrb[4].mxu0 }
 0x11b   : > { %v1255_v37 = vpop.f32.mrb[5].mxu0 }
 0x11c   : > { %v1256_v38 = vadd.f32 %v1255_v37, %v1254_v36  ;;  %v1257_v39 = vpop.f32.mrb[6].mxu0 }
 0x11d   : > { %v1258_v40 = vpop.f32.mrb[7].mxu0 }
 0x11e   : > { %v1259_v41 = vadd.f32 %v1258_v40, %v1257_v39  ;;  %v911_v42 = vadd.f32 %v1256_v38, %v870_v33 }
 0x120   : > { %v914_v43 = vadd.f32 %v1259_v41, %v873_v35 }
 0x137   : > { %v951_v44 = vpop.f32.mrb[4].mxu1 }
 0x138   : > { %v952_v45 = vadd.f32 %v951_v44, %v911_v42  ;;  %v953_v46 = vpop.f32.mrb[5].mxu1 }
 0x139   : > { %v954_v47 = vpop.f32.mrb[6].mxu1 }
 0x13a   : > { %v955_v48 = vadd.f32 %v954_v47, %v914_v43  ;;  %v956_v49 = vpop.f32.mrb[7].mxu1  ;;  %v958_v50 = vmax.f32 %v952_v45, 0.0 }
 0x13c   : > { %v959_v51 = vmax.f32 %v955_v48, 0.0 }
 0x13e   : > { %v960_v52 = vpack.c.bf16 %v959_v51, %v958_v50 }
 0x140   : > { %1268 = vmatmul.mubr.msk.bf16.vlgmr.msra.gmra.mrb[8].mxu0 %vm984_vm2, %v960_v52 }
 0x213   : > { %v1022_v54 = vpop.f32.mrb[8].mxu0 }
 0x214   : > { %v1269_v55 = vpop.f32.mrb[9].mxu0  ;;  %v1023_v57 = vadd.f32 %v1178_v53, %v1022_v54 }
 0x215   : > { %v1025_v56 = vpop.f32.mrb[10].mxu0 }
 0x216   : > { %v1026_v58 = vadd.f32 %v1178_v53, %v1025_v56  ;;  %v1270_v59 = vpop.f32.mrb[11].mxu0 }
 0x218   : > { %v1192_v60 = vpack.c.bf16 %v1026_v58, %v1023_v57 }
 0x21a   : > { %1193 = vst [vmem:[%s229_s25] sm:$0xff] %v1192_v60  }
 0x21b PF: > { %s15_s18 = sadd.s32 1, %s1353_s18  }
 0x21c   : > { %p12_p4 = scmp.ge.s32.totalorder %s15_s18, 4  }
 0x21e   :  { %14 = sbr.rel (!%p12_p4) target bundleno = 1 (0x1), region = 70 }

</bundles_post_ra>
